<compile_context>
chip_gen: v6e
topology: v6e:2x2x1
jax: 0.10.0
libtpu: 0.0.40
codegen_flags: <defaults>
</compile_context>

<pallas_src>
import functools

import numpy as np

import jax
import jax.numpy as jnp
from jax.experimental import pallas as pl
from jax.experimental.pallas import tpu as pltpu


def _round_up(x, n):
    return -(-x // n) * n


_SUBLANE = {4: 8, 2: 16, 1: 32}  # second-minor alignment per itemsize


def _plan(B, C, H, W, s, dtype):
    """Pick the row-merge factor m, the row block Rb and VMEM limit."""
    Ho, Wo = H // s, W // s
    itemsize = jnp.dtype(dtype).itemsize
    sub = _SUBLANE.get(itemsize, 8)
    cdt = dtype if jnp.issubdtype(dtype, jnp.floating) else jnp.float32
    csize = jnp.dtype(cdt).itemsize

    # --- row-merge factor m (merge k = m*s input rows into the lane axis) ---
    # Cap the perm-matmul contraction width so the MXU work stays well below
    # the HBM roofline on the weakest generation (v5e).
    kw_cap = 160 if csize >= 4 else 384
    cands = [mm for mm in range(1, Ho + 1) if Ho % mm == 0 and mm * s * W <= kw_cap]
    if not cands:
        cands = [1]
    dense = [mm for mm in cands if (mm * Wo) % 128 == 0]   # fully lane-dense stores
    wide = [mm for mm in cands if mm * Wo >= 128]          # at least one full vreg
    if dense:
        m = min(dense)
    elif wide:
        m = min(wide)
    else:
        m = max(cands)                                     # densest we can get

    KW = m * s * W                       # contraction width of the permutation
    Wp = _round_up(m * Wo, 128)          # vreg-aligned phase-slab pitch
    N = s * s * Wp                       # permutation output width
    R = C * Ho // m                      # rows of the merged input/output views

    # --- padded-VMEM footprint (double-buffered in/out, f32 intermediate) ---
    lanes_in = _round_up(KW, 128)
    lanes_out = _round_up(m * Wo, 128)
    perm_bytes = 2 * _round_up(KW, _SUBLANE.get(csize, 8)) * _round_up(N, 128) * csize

    def footprint(rb):
        rows_nat = _round_up(rb, sub)
        rows_f32 = _round_up(rb, 8)
        in_b = 2 * rows_nat * lanes_in * itemsize                 # input block (x2 buf)
        out_b = 2 * s * s * rows_nat * lanes_out * itemsize       # output block (x2 buf)
        y_b = rows_f32 * _round_up(N, 128) * 4                    # f32 matmul result
        cast_b = rows_f32 * lanes_in * csize if cdt != dtype else 0
        return in_b + out_b + y_b + cast_b + perm_bytes

    target = 24 * 1024 * 1024            # generation-safe (v7x has 64 MiB / TC)
    divs = [d for d in range(1, R + 1) if R % d == 0]
    legal = [d for d in divs if d == R or d % sub == 0]
    fitting = [d for d in legal if footprint(d) <= target]
    if not fitting:
        fitting = [min(legal, key=footprint)]
    # Keep the grid multi-step when the batch alone is not enough (2-TC chips).
    multi = [d for d in fitting if B * (R // d) >= 2]
    rb = max(multi) if multi else max(fitting)

    vmem_limit = int(min(48 * 1024 * 1024, max(32 * 1024 * 1024, 2 * footprint(rb))))
    return m, rb, Wp, cdt, vmem_limit


def _make_perm(s, m, W, Wo, Wp, dtype):
    """Exact 0/1 permutation: input lane (p*s+a)*W + j*s + d of a merged row
    group is routed to column (a*s+d)*Wp + p*Wo + j (phase slabs on vreg
    boundaries).  Built once at trace time (static), DMA'd once."""
    KW = m * s * W
    lin = np.arange(KW)
    li, wi = lin // W, lin % W
    p, a = li // s, li % s
    j, d = wi // s, wi % s
    dest = (a * s + d) * Wp + p * Wo + j
    perm = np.zeros((KW, s * s * Wp), dtype=np.float32)
    perm[lin, dest] = 1.0
    return jnp.asarray(perm, dtype=dtype)


def _reorg_kernel(x_ref, p_ref, o_ref, *, s, m, Wo, Wp):
    """x_ref: (1, Rb, m*s*W), p_ref: (m*s*W, s*s*Wp), o_ref: (1, s*s, Rb, m*Wo)."""
    x = x_ref[0]                                   # (Rb, m*s*W)
    perm = p_ref[...]                              # VMEM-resident constant
    # MXU does all the (de-)interleaving work; it is otherwise idle in a copy
    # kernel.  HIGHEST keeps the f32 path bit-exact (exact anyway for bf16).
    y = jnp.dot(
        x.astype(perm.dtype),
        perm,
        preferred_element_type=jnp.float32,
        precision=jax.lax.Precision.HIGHEST,
    ).astype(o_ref.dtype)
    # Each phase slab starts at a 128-lane boundary -> pure (possibly tail-
    # masked) stores, no lane rotates, no sublane-strided selects.
    for q in range(s * s):
        o_ref[0, q, :, :] = y[:, q * Wp:q * Wp + m * Wo]


@functools.partial(jax.jit, static_argnames=("stride",))
def reorg(x, *, stride: int = 2):
    """Pallas Reorg. x: (B, C, H, W) -> (B, stride*stride*C, H//s, W//s)."""
    B, C, H, W = x.shape
    s = int(stride)
    assert H % s == 0 and W % s == 0, "H and W must be divisible by stride"
    Ho, Wo = H // s, W // s

    m, Rb, Wp, cdt, vmem_limit = _plan(B, C, H, W, s, x.dtype)
    k = m * s
    KW = k * W
    R = C * Ho // m
    N = s * s * Wp
    n_rb = R // Rb

    perm = _make_perm(s, m, W, Wo, Wp, cdt)

    # Free row-major views (dim merges only -- no data movement).
    x_rows = x.reshape(B, R, KW)

    itemsize = jnp.dtype(x.dtype).itemsize
    cost = pl.CostEstimate(
        flops=2 * B * R * KW * N,
        transcendentals=0,
        bytes_accessed=2 * B * C * H * W * itemsize + perm.size * perm.dtype.itemsize,
    )

    out_v = pl.pallas_call(
        functools.partial(_reorg_kernel, s=s, m=m, Wo=Wo, Wp=Wp),
        out_shape=jax.ShapeDtypeStruct((B, s * s, R, m * Wo), x.dtype),
        grid=(B, n_rb),
        in_specs=[
            pl.BlockSpec((1, Rb, KW), lambda b, r: (b, r, 0)),
            # Constant index_map: the permutation is fetched once and reused.
            pl.BlockSpec((KW, N), lambda b, r: (0, 0)),
        ],
        out_specs=pl.BlockSpec((1, s * s, Rb, m * Wo), lambda b, r: (b, 0, r, 0)),
        compiler_params=pltpu.CompilerParams(
            dimension_semantics=("parallel", "parallel"),
            vmem_limit_bytes=vmem_limit,
        ),
        cost_estimate=cost,
    )(x_rows, perm)

    # (B, s*s, C*Ho/m, m*Wo) -> (B, s*s*C, Ho, Wo): contiguous re-factorisation.
    return out_v.reshape(B, s * s * C, Ho, Wo)


def reorg_reference(x, stride: int = 2):
    """Pure-JAX transcription of the PyTorch forward (for verification)."""
    B, C, H, W = x.shape
    s = stride
    y = x.reshape(B, C, H // s, s, W // s, s).transpose(0, 1, 2, 4, 3, 5)
    y = y.reshape(B, C, (H // s) * (W // s), s * s).transpose(0, 1, 3, 2)
    y = y.reshape(B, C, s * s, H // s, W // s).transpose(0, 2, 1, 3, 4)
    return y.reshape(B, s * s * C, H // s, W // s)


if __name__ == "__main__":
    key = jax.random.PRNGKey(0)

    # Primary case (matches the module's intended usage at small shapes).
    B, C, H, W = 2, 4, 16, 16
    x = jax.random.normal(key, (B, C, H, W), dtype=jnp.float32)
    out = jax.block_until_ready(reorg(x, stride=2))
    ref = reorg_reference(x, stride=2)
    assert out.shape == (B, 4 * C, H // 2, W // 2), out.shape
    assert out.dtype == x.dtype
    assert jnp.array_equal(out, ref), "Pallas reorg mismatch vs reference (case 1)"

    # Second case: B=1 with more channels -> exercises row-block tiling and the
    # multi-step-grid preference.
    x2 = jax.random.normal(jax.random.PRNGKey(0), (1, 16, 16, 16), dtype=jnp.float32)
    out2 = jax.block_until_ready(reorg(x2, stride=2))
    ref2 = reorg_reference(x2, stride=2)
    assert out2.shape == (1, 64, 8, 8), out2.shape
    assert jnp.array_equal(out2, ref2), "Pallas reorg mismatch vs reference (case 2)"

    print("KERNEL_OK")
</pallas_src>

<mosaic_0001>
module attributes {stable_mosaic.version = 11 : i64} {
  func.func @_reorg_kernel(%arg0: i32, %arg1: i32, %arg2: memref<1x8x128xf32, #tpu.memory_space<vmem>>, %arg3: memref<128x512xf32, #tpu.memory_space<vmem>>, %arg4: memref<1x4x8x32xf32, #tpu.memory_space<vmem>>) attributes {dimension_semantics = [#tpu.dimension_semantics<parallel>, #tpu.dimension_semantics<parallel>], iteration_bounds = array<i64: 2, 1>, scalar_prefetch = 0 : i64, scratch_operands = 0 : i64, tpu.core_type = #tpu.core_type<tc>, window_params = [{transform_indices = @transform_0, window_bounds = array<i64: 1, 8, 128>}, {pipeline_mode = #tpu.pipeline_mode<synchronous>, transform_indices = @transform_1, window_bounds = array<i64: 128, 512>}, {transform_indices = @transform_2, window_bounds = array<i64: 1, 4, 8, 32>}]} {
    %c0 = arith.constant 0 : index
    %c0_0 = arith.constant 0 : index
    %c0_1 = arith.constant 0 : index
    %0 = vector.load %arg2[%c0, %c0_0, %c0_1] : memref<1x8x128xf32, #tpu.memory_space<vmem>>, vector<1x8x128xf32>
    %1 = vector.shape_cast %0 : vector<1x8x128xf32> to vector<8x128xf32>
    %c0_2 = arith.constant 0 : index
    %c0_3 = arith.constant 0 : index
    %2 = vector.load %arg3[%c0_2, %c0_3] : memref<128x512xf32, #tpu.memory_space<vmem>>, vector<128x512xf32>
    %cst = arith.constant dense<0.000000e+00> : vector<8x512xf32>
    %3 = tpu.matmul %1, %2, %cst {dimension_numbers = #tpu.dot_dimension_numbers<[1], [0], [0], [1], [0, 0, 1, 1], [], []>, precision = #tpu.contract_precision<fp32>} : vector<8x128xf32>, vector<128x512xf32>, vector<8x512xf32> -> vector<8x512xf32>
    %4 = vector.extract_strided_slice %3 {offsets = [0, 0], sizes = [8, 32], strides = [1, 1]} : vector<8x512xf32> to vector<8x32xf32>
    %c0_4 = arith.constant 0 : index
    %c0_5 = arith.constant 0 : index
    %c0_6 = arith.constant 0 : index
    %c0_7 = arith.constant 0 : index
    %5 = vector.load %arg4[%c0_4, %c0_5, %c0_6, %c0_7] : memref<1x4x8x32xf32, #tpu.memory_space<vmem>>, vector<1x1x8x32xf32>
    %6 = vector.shape_cast %5 : vector<1x1x8x32xf32> to vector<8x32xf32>
    %7 = vector.shape_cast %4 : vector<8x32xf32> to vector<1x1x8x32xf32>
    tpu.vector_store %arg4[%c0_4, %c0_5, %c0_6, %c0_7], %7 {strides = array<i32>} : memref<1x4x8x32xf32, #tpu.memory_space<vmem>>, vector<1x1x8x32xf32>,
    %8 = vector.extract_strided_slice %3 {offsets = [0, 128], sizes = [8, 32], strides = [1, 1]} : vector<8x512xf32> to vector<8x32xf32>
    %c0_8 = arith.constant 0 : index
    %c1 = arith.constant 1 : index
    %c0_9 = arith.constant 0 : index
    %c0_10 = arith.constant 0 : index
    %9 = vector.load %arg4[%c0_8, %c1, %c0_9, %c0_10] : memref<1x4x8x32xf32, #tpu.memory_space<vmem>>, vector<1x1x8x32xf32>
    %10 = vector.shape_cast %9 : vector<1x1x8x32xf32> to vector<8x32xf32>
    %11 = vector.shape_cast %8 : vector<8x32xf32> to vector<1x1x8x32xf32>
    tpu.vector_store %arg4[%c0_8, %c1, %c0_9, %c0_10], %11 {strides = array<i32>} : memref<1x4x8x32xf32, #tpu.memory_space<vmem>>, vector<1x1x8x32xf32>,
    %12 = vector.extract_strided_slice %3 {offsets = [0, 256], sizes = [8, 32], strides = [1, 1]} : vector<8x512xf32> to vector<8x32xf32>
    %c0_11 = arith.constant 0 : index
    %c2 = arith.constant 2 : index
    %c0_12 = arith.constant 0 : index
    %c0_13 = arith.constant 0 : index
    %13 = vector.load %arg4[%c0_11, %c2, %c0_12, %c0_13] : memref<1x4x8x32xf32, #tpu.memory_space<vmem>>, vector<1x1x8x32xf32>
    %14 = vector.shape_cast %13 : vector<1x1x8x32xf32> to vector<8x32xf32>
    %15 = vector.shape_cast %12 : vector<8x32xf32> to vector<1x1x8x32xf32>
    tpu.vector_store %arg4[%c0_11, %c2, %c0_12, %c0_13], %15 {strides = array<i32>} : memref<1x4x8x32xf32, #tpu.memory_space<vmem>>, vector<1x1x8x32xf32>,
    %16 = vector.extract_strided_slice %3 {offsets = [0, 384], sizes = [8, 32], strides = [1, 1]} : vector<8x512xf32> to vector<8x32xf32>
    %c0_14 = arith.constant 0 : index
    %c3 = arith.constant 3 : index
    %c0_15 = arith.constant 0 : index
    %c0_16 = arith.constant 0 : index
    %17 = vector.load %arg4[%c0_14, %c3, %c0_15, %c0_16] : memref<1x4x8x32xf32, #tpu.memory_space<vmem>>, vector<1x1x8x32xf32>
    %18 = vector.shape_cast %17 : vector<1x1x8x32xf32> to vector<8x32xf32>
    %19 = vector.shape_cast %16 : vector<8x32xf32> to vector<1x1x8x32xf32>
    tpu.vector_store %arg4[%c0_14, %c3, %c0_15, %c0_16], %19 {strides = array<i32>} : memref<1x4x8x32xf32, #tpu.memory_space<vmem>>, vector<1x1x8x32xf32>,
    return
  }
  func.func @transform_0(%arg0: i32, %arg1: i32) -> (i32, i32, i32) {
    %c0_i32 = arith.constant 0 : i32
    %c0_i32_0 = arith.constant 0 : i32
    return %arg0, %arg1, %c0_i32 : i32, i32, i32
  }
  func.func @transform_1(%arg0: i32, %arg1: i32) -> (i32, i32) {
    %c0_i32 = arith.constant 0 : i32
    %c0_i32_0 = arith.constant 0 : i32
    %c0_i32_1 = arith.constant 0 : i32
    return %c0_i32, %c0_i32_0 : i32, i32
  }
  func.func @transform_2(%arg0: i32, %arg1: i32) -> (i32, i32, i32, i32) {
    %c0_i32 = arith.constant 0 : i32
    %c0_i32_0 = arith.constant 0 : i32
    %c0_i32_1 = arith.constant 0 : i32
    return %arg0, %c0_i32, %arg1, %c0_i32_0 : i32, i32, i32, i32
  }
}

</mosaic_0001>

<bundles_post_ra>
// kernel: reorg.1
= control target key start
LH: loop header
LB: loop body
LE: loop exit
PB: predicated region body
PF: predicated region fallthrough
CT: control target
= control target key end

     0   :  { %7 = vsyncpa [#allocation3], 0  ;;  %s2190_s9 = smov 0   ;;  %s2192_s10 = smov 0   ;;  %s3402_s0 = inlined_call_operand.vmem [shape: f32[2,8,128], index: 0, kind: input, shape index: {}]   ;;  %s3403_s1 = inlined_call_operand.hbm [shape: f32[128,512], index: 1, kind: input, shape index: {}]   ;;  %s3404_s2 = inlined_call_operand.vmem [shape: f32[2,4,8,32], index: 2, kind: output, shape index: {}]  }
   0x1   :  { %s2194_s11 = smov 0  }
   0x2 LB: > { %s2063_s12 = sadd.s32 4294967295, %s2169_s11   ;;  %s25_s13 = sadd.s32 1, %s2165_s10  ;;  %s2169_s11 = sphi %s2194_s11, %s13_s11   ;;  %s2165_s10 = sphi %s2192_s10, %s3724_s10   ;;  %s2161_s9 = sphi %s2190_s9, %s3723_s9  }
   0x3   : > { %p27_p0 = scmp.ge.s32.totalorder %s25_s13, 2  ;;  %p2065_p1 = scmp.ge.s32.totalorder %s2169_s11, 1 }
   0x4   : > { %p107_p2 = scmp.lt.s32.totalorder %s2169_s11, 3  ;;  %p2215_p4 = scmp.eq.s32.totalorder %s2063_s12, 0 }
   0x5   : > { %s3726_s13 = smov (%p27_p0, %s25_s13), 0  ;;  %s2171_s16 = smov [#allocation2]  }
   0x6   : > { %p2211_p3 = pnand %p2065_p1, %p107_p2  ;;  %s119_s17 = sshll.u32 %s2171_s16, 4  ;;  %s120_s17 = int_to_ptr.vmem [resolvable:$true] %s119_s17 }
   0x7   : > { %s2128_s18 = scalar_lea.vmem %s120_s17, 8192  ;;  %p2136_p11 = scmp.lt.s32.totalorder %s120_s17, %s120_s17 }
   0x8   : > { %p2083_p5 = pneg %p2211_p3  ;;  %p2129_p8 = scmp.ne.s32.totalorder %s120_s17, %s2128_s18 }
   0x9   : > { %p2137_p12 = scmp.lt.s32.totalorder %s2128_s18, %s2128_s18 }
   0xa   : > { %p2084_p6 = pnand %p2215_p4, %p2083_p5 }
   0xb   : > { %p2138_p13 = por %p2137_p12, %p2136_p11 }
   0xc   : > { %p2119_p7 = pneg %p2084_p6 }
   0xe   : > { %p2131_p9 = pnand %p2129_p8, %p2119_p7 }
  0x10   : > { %p2132_p10 = pneg %p2131_p9 }
  0x12   : > { %p2139_p0 = pnand %p2138_p13, %p2132_p10 }
  0x14   : > { %2142 = shalt.err (!%p2139_p0)
}
  0x15   : > { %s2172_s19 = smov 512   ;;  %s2173_s20 = smov 32  }
  0x16   : > { %2086 = dma.hbm_to_vmem [thread:$0]  (!%p2084_p6), %s3403_s1, 8192, %s120_s17, [#allocation3], %s2172_s19, %s2172_s19, %s2173_s20  }
  0x17   : > { %145 = sbr.rel (%p2211_p3) target bundleno = 446 (0x1be), region = 28 }
  0x1c   : > { %2156 = dma.done.wait (%p2215_p4), [#allocation3], 8192  }
  0x1d   : > { %2158 = vsyncadd (%p2215_p4), [#allocation3], 4294959104  ;;  %v3419_v0 = vmov 0.0   ;;  %v249_v1 = vld [vmem:[#allocation2 + $0x1e8] sm:$0xff]  ;;  %v248_v2 = vld [vmem:[#allocation2 + $0x1e0] sm:$0xff]  ;;  %p172_p1 = scmp.lt.s32.totalorder %s2161_s9, 1 }
  0x1e   : > { %348 = vmatprep.mubr.f32.mxu0 %v3419_v0  ;;  %584 = vmatprep.mubr.f32.mxu1 %v3419_v0  ;;  %v245_v3 = vld [vmem:[#allocation2 + $0x1c8] sm:$0xff]  ;;  %v2234_v4 = vand.u32 4294901760, %v249_v1  ;;  %v2236_v5 = vand.u32 4294901760, %v248_v2  ;;  %v244_v7 = vld [vmem:[#allocation2 + $0x1c0] sm:$0xff]  ;;  %vm1962_vm0 = vcmask 261120  }
  0x1f   : > { %v2238_v6 = vand.u32 4294901760, %v245_v3  ;;  %v241_v8 = vld [vmem:[#allocation2 + $0x1a8] sm:$0xff]  ;;  %v240_v9 = vld [vmem:[#allocation2 + $0x1a0] sm:$0xff]  ;;  %v2240_v10 = vand.u32 4294901760, %v244_v7  ;;  %s3728_s9 = smov (!%p172_p1, %s2161_s9), 1 }
  0x20   : > { %v2242_v11 = vand.u32 4294901760, %v241_v8  ;;  %v2244_v12 = vand.u32 4294901760, %v240_v9  ;;  %v237_v13 = vld [vmem:[#allocation2 + $0x188] sm:$0xff]  ;;  %v236_v14 = vld [vmem:[#allocation2 + $0x180] sm:$0xff]  ;;  %253 = vmatprep.subr.mxu0 %v2234_v4  ;;  %v2254_v19 = vsub.f32 %v249_v1, %v2234_v4  ;;  %v2267_v24 = vsub.f32 %v248_v2, %v2236_v5  ;;  %s2070_s23 = sshll.u32 %s3728_s9, 3  ;;  %s2078_s27 = sshll.u32 %s3728_s9, 5 }
  0x21   : > { %v233_v15 = vld [vmem:[#allocation2 + $0x168] sm:$0xff]  ;;  %v2247_v16 = vand.u32 4294901760, %v237_v13  ;;  %v2249_v17 = vand.u32 4294901760, %v236_v14  ;;  %v2256_v20 = vld [vmem:[#allocation2 + $0x160] sm:$0xff]  ;;  %255 = vmatpush1.msra.mxu0 %v2236_v5  ;;  %v2273_v26 = vsub.f32 %v245_v3, %v2238_v6  ;;  %v2287_v32 = vsub.f32 %v244_v7, %v2240_v10  ;;  %s178_s26 = scalar_lea.vmem %s3402_s0, %s2070_s23  ;;  %s3383_s30 = scalar_lea.vmem %s3404_s2, %s2078_s27 }
  0x22   : > { %v2251_v18 = vand.u32 4294901760, %v233_v15  ;;  %v2258_v21 = vld [vmem:[#allocation2 + $0x148] sm:$0xff]  ;;  %v2260_v22 = vld [vmem:[#allocation2 + $0x140] sm:$0xff]  ;;  %v2264_v23 = vand.u32 4294901760, %v2256_v20  ;;  %257 = vmatprep.subr.mxu0 %v2238_v6  ;;  %v3418_v30 = vand.u32 4294901760, %v2254_v19  ;;  %v3416_v34 = vand.u32 4294901760, %v2267_v24 }
  0x23   : > { %v2270_v25 = vand.u32 4294901760, %v2258_v21  ;;  %v2275_v27 = vld [vmem:[#allocation2 + $0x128] sm:$0xff]  ;;  %v2277_v28 = vld [vmem:[#allocation2 + $0x120] sm:$0xff]  ;;  %v2284_v31 = vand.u32 4294901760, %v2260_v22  ;;  %259 = vmatpush1.msra.mxu0 %v2240_v10  ;;  %v3414_v35 = vand.u32 4294901760, %v2273_v26  ;;  %v2296_v36 = vsub.f32 %v241_v8, %v2242_v11 }
  0x24   : > { %v2279_v29 = vld [vmem:[#allocation2 + $0x108] sm:$0xff]  ;;  %v2290_v33 = vand.u32 4294901760, %v2275_v27  ;;  %v2299_v37 = vand.u32 4294901760, %v2277_v28  ;;  %v2301_v38 = vld [vmem:[#allocation2 + $0x100] sm:$0xff]  ;;  %261 = vmatprep.subr.mxu0 %v2242_v11  ;;  %v363_v39 = vsub.f32 %v2254_v19, %v3418_v30  ;;  %v3413_v40 = vand.u32 4294901760, %v2287_v32 }
  0x25   : > { %3533 = vst [vmem:[#allocation5_spill] sm:$0xff] %v2284_v31  ;;  %v2309_v41 = vsub.f32 %v240_v9, %v2244_v12  ;;  %v2312_v42 = vand.u32 4294901760, %v2279_v29  ;;  %263 = vmatpush1.msra.mxu0 %v2244_v12  ;;  %v369_v43 = vsub.f32 %v2267_v24, %v3416_v34  ;;  %v375_v44 = vsub.f32 %v2273_v26, %v3414_v35  ;;  %v2325_v47 = vld [vmem:[#allocation2 + $0xe8] sm:$0xff]  ;;  %v2335_v52 = vld [vmem:[#allocation2 + $0xe0] sm:$0xff] }
  0x26   : > { %3534 = vst [vmem:[#allocation6_spill] sm:$0xff] %v2290_v33  ;;  %3535 = vst [vmem:[#allocation7_spill] sm:$0xff] %v2299_v37  ;;  %v3411_v45 = vand.u32 4294901760, %v2296_v36  ;;  %v2323_v46 = vsub.f32 %v237_v13, %v2247_v16  ;;  %265 = vmatprep.subr.mxu0 %v2247_v16  ;;  %v364_v48 = vand.u32 4294901760, %v363_v39  ;;  %v381_v49 = vsub.f32 %v2287_v32, %v3413_v40  ;;  %v2342_v57 = vld [vmem:[#allocation2 + $0xc8] sm:$0xff]  ;;  %v2354_v62 = vld [vmem:[#allocation2 + $0xc0] sm:$0xff] }
  0x27   : > { %3536 = vst [vmem:[#allocation8_spill] sm:$0xff] %v2312_v42  ;;  %v3409_v50 = vand.u32 4294901760, %v2309_v41  ;;  %v2333_v51 = vand.u32 4294901760, %v2301_v38  ;;  %267 = vmatpush1.msra.mxu0 %v2249_v17  ;;  %v370_v53 = vand.u32 4294901760, %v369_v43  ;;  %v376_v54 = vand.u32 4294901760, %v375_v44  ;;  %v2366_v7 = vld [vmem:[#allocation2 + $0xa8] sm:$0xff] }
  0x28   : > { %v387_v55 = vsub.f32 %v2296_v36, %v3411_v45  ;;  %v3408_v56 = vand.u32 4294901760, %v2323_v46  ;;  %269 = vmatprep.subr.mxu0 %v2251_v18  ;;  %365 = vmatprep.subr.mxu1 %v364_v48  ;;  %v382_v58 = vand.u32 4294901760, %v381_v49  ;;  %v2349_v60 = vsub.f32 %v236_v14, %v2249_v17  ;;  %v2445_v45 = vld [vmem:[#allocation2 + $0x60] sm:$0xff]  ;;  %v2463_v40 = vld [vmem:[#allocation2 + $0x48] sm:$0xff] }
  0x29   : > { %3537 = vst [vmem:[#allocation9_spill] sm:$0xff] %v2333_v51  ;;  %v393_v59 = vsub.f32 %v2309_v41, %v3409_v50  ;;  %v2352_v61 = vand.u32 4294901760, %v2325_v47  ;;  %271 = vmatpush1.msra.mxu0 %v2264_v23  ;;  %371 = vmatpush1.msra.mxu1 %v370_v53  ;;  %v2361_v2 = vsub.f32 %v233_v15, %v2251_v18  ;;  %v2364_v3 = vand.u32 4294901760, %v2335_v52  ;;  %v2377_v15 = vld [vmem:[#allocation2 + $0xa0] sm:$0xff]  ;;  %v2484_v30 = vld [vmem:[#allocation2 + $0x28] sm:$0xff] }
  0x2a   : > { %v388_v63 = vand.u32 4294901760, %v387_v55  ;;  %v399_v1 = vsub.f32 %v2323_v46, %v3408_v56  ;;  %273 = vmatprep.subr.mxu0 %v2270_v25  ;;  %377 = vmatprep.subr.mxu1 %v376_v54  ;;  %v3406_v9 = vand.u32 4294901760, %v2349_v60  ;;  %v2372_v13 = vsub.f32 %v2256_v20, %v2264_v23  ;;  %v2434_v56 = vld [vmem:[#allocation2 + $0x68] sm:$0xff]  ;;  %v2473_v34 = vld [vmem:[#allocation2 + $0x40] sm:$0xff] }
  0x2b   : > { %3538 = vst [vmem:[#allocation10_spill] sm:$0xff] %v2352_v61  ;;  %3539 = vst [vmem:[#allocation11_spill] sm:$0xff] %v2364_v3  ;;  %v394_v8 = vand.u32 4294901760, %v393_v59  ;;  %v2375_v14 = vand.u32 4294901760, %v2342_v57  ;;  %275 = vmatpush1.msra.mxu0 %v2284_v31  ;;  %383 = vmatpush1.msra.mxu1 %v382_v58  ;;  %v3405_v43 = vand.u32 4294901760, %v2361_v2  ;;  %v2383_v44 = vsub.f32 %v2258_v21, %v2270_v25  ;;  %v2400_v21 = vld [vmem:[#allocation2 + $0x88] sm:$0xff] }
  0x2c   : > { %v400_v39 = vand.u32 4294901760, %v399_v1  ;;  %v2386_v48 = vand.u32 4294901760, %v2354_v62  ;;  %277 = vmatprep.subr.mxu0 %v2290_v33  ;;  %389 = vmatprep.subr.mxu1 %v388_v63  ;;  %v405_v20 = vsub.f32 %v2349_v60, %v3406_v9  ;;  %v3407_v49 = vand.u32 4294901760, %v2372_v13 }
  0x2d   : > { %3540 = vst [vmem:[#allocation12_spill] sm:$0xff] %v2375_v14  ;;  %v2395_v53 = vsub.f32 %v2260_v22, %v2284_v31  ;;  %v2398_v54 = vand.u32 4294901760, %v2366_v7  ;;  %279 = vmatpush1.msra.mxu0 %v2299_v37  ;;  %395 = vmatpush1.msra.mxu1 %v394_v8  ;;  %v411_v55 = vsub.f32 %v2361_v2, %v3405_v43  ;;  %v3410_v58 = vand.u32 4294901760, %v2383_v44 }
  0x2e   : > { %3541 = vst [vmem:[#allocation13_spill] sm:$0xff] %v2386_v48  ;;  %v2410_v59 = vsub.f32 %v2275_v27, %v2290_v33  ;;  %v2413_v22 = vand.u32 4294901760, %v2377_v15  ;;  %281 = vmatprep.subr.mxu0 %v2312_v42  ;;  %401 = vmatprep.subr.mxu1 %v400_v39  ;;  %v406_v63 = vand.u32 4294901760, %v405_v20  ;;  %v417_v1 = vsub.f32 %v2372_v13, %v3407_v49  ;;  %v2424_v27 = vld [vmem:[#allocation2 + $0x80] sm:$0xff] }
  0x2f   : > { %3542 = vst [vmem:[#allocation14_spill] sm:$0xff] %v2398_v54  ;;  %v3412_v8 = vand.u32 4294901760, %v2395_v53  ;;  %v2422_v43 = vsub.f32 %v2277_v28, %v2299_v37  ;;  %283 = vmatpush1.msra.mxu0 %v2333_v51  ;;  %v412_v9 = vand.u32 4294901760, %v411_v55  ;;  %v423_v39 = vsub.f32 %v2383_v44, %v3410_v58  ;;  %v187_v33 = vld [vmem:[%s178_s26] sm:$0xff] }
  0x30   : > { %3543 = vst [vmem:[#allocation15_spill] sm:$0xff] %v2413_v22  ;;  %v3415_v20 = vand.u32 4294901760, %v2410_v59  ;;  %v2432_v49 = vand.u32 4294901760, %v2400_v21  ;;  %407 = vmatpush1.msra.mxu1 %v406_v63  ;;  %285 = vmatprep.subr.mxu0 %v2352_v61  ;;  %v418_v28 = vand.u32 4294901760, %v417_v1  ;;  %v2443_v58 = vsub.f32 %v2279_v29, %v2312_v42 }
  0x31   : > { %v429_v50 = vsub.f32 %v2395_v53, %v3412_v8  ;;  %v3417_v55 = vand.u32 4294901760, %v2422_v43  ;;  %413 = vmatprep.subr.mxu1 %v412_v9  ;;  %287 = vmatpush1.msra.mxu0 %v2364_v3  ;;  %v424_v63 = vand.u32 4294901760, %v423_v39  ;;  %v2457_v8 = vand.u32 4294901760, %v2424_v27 }
  0x32   : > { %3544 = vst [vmem:[#allocation16_spill] sm:$0xff] %v2432_v49  ;;  %v435_v1 = vsub.f32 %v2410_v59, %v3415_v20  ;;  %v2461_v29 = vsub.f32 %v2301_v38, %v2333_v51  ;;  %419 = vmatpush1.msra.mxu1 %v418_v28  ;;  %289 = vmatprep.subr.mxu0 %v2375_v14  ;;  %v3421_v35 = vand.u32 4294901760, %v2443_v58  ;;  %v2471_v20 = vand.u32 4294901760, %v2434_v56 }
  0x33   : > { %3545 = vst [vmem:[#allocation17_spill] sm:$0xff] %v2457_v8  ;;  %v430_v9 = vand.u32 4294901760, %v429_v50  ;;  %v441_v39 = vsub.f32 %v2422_v43, %v3417_v55  ;;  %425 = vmatprep.subr.mxu1 %v424_v63  ;;  %291 = vmatpush1.msra.mxu0 %v2386_v48  ;;  %v2479_v50 = vsub.f32 %v2325_v47, %v2352_v61  ;;  %v2482_v55 = vand.u32 4294901760, %v2445_v45 }
  0x34   : > { %3546 = vst [vmem:[#allocation18_spill] sm:$0xff] %v2471_v20  ;;  %v436_v38 = vand.u32 4294901760, %v435_v1  ;;  %v3426_v28 = vand.u32 4294901760, %v2461_v29  ;;  %293 = vmatprep.subr.mxu0 %v2398_v54  ;;  %v447_v63 = vsub.f32 %v2443_v58, %v3421_v35  ;;  %v2492_v1 = vsub.f32 %v2335_v52, %v2364_v3  ;;  %v2510_v3 = vld [vmem:[#allocation2 + $0x20] sm:$0xff] }
  0x35   : > { %3547 = vst [vmem:[#allocation19_spill] sm:$0xff] %v2482_v55  ;;  %431 = vmatpush1.msra.mxu1 %v430_v9  ;;  %v442_v0 = vand.u32 4294901760, %v441_v39  ;;  %v2495_v47 = vand.u32 4294901760, %v2463_v40  ;;  %295 = vmatpush1.msra.mxu0 %v2413_v22  ;;  %v2505_v35 = vsub.f32 %v2342_v57, %v2375_v14  ;;  %v2508_v52 = vand.u32 4294901760, %v2473_v34  ;;  %v2521_v57 = vld [vmem:[#allocation2 + $0x8] sm:$0xff] }
  0x36   : > { %437 = vmatprep.subr.mxu1 %v436_v38  ;;  %v453_v9 = vsub.f32 %v2461_v29, %v3426_v28  ;;  %297 = vmatprep.subr.mxu0 %v2432_v49  ;;  %v448_v38 = vand.u32 4294901760, %v447_v63  ;;  %v2516_v28 = vsub.f32 %v2354_v62, %v2386_v48  ;;  %v2519_v39 = vand.u32 4294901760, %v2484_v30  ;;  %v2547_v63 = vld [vmem:[#allocation2] sm:$0xff] }
  0x37   : > { %3548 = vst [vmem:[#allocation20_spill] sm:$0xff] %v2495_v47  ;;  %3549 = vst [vmem:[#allocation21_spill] sm:$0xff] %v2508_v52  ;;  %443 = vmatpush1.msra.mxu1 %v442_v0  ;;  %299 = vmatpush1.msra.mxu0 %v2457_v8  ;;  %v3551_v51 = vand.u32 4294901760, %v2479_v50  ;;  %v2530_v61 = vsub.f32 %v2366_v7, %v2398_v54  ;;  %v3552_v62 = vand.u32 4294901760, %v2492_v1  ;;  %v2555_v48 = vand.u32 4294901760, %v2521_v57 }
  0x38   : > { %3550 = vst [vmem:[#allocation22_spill] sm:$0xff] %v2519_v39  ;;  %v454_v14 = vand.u32 4294901760, %v453_v9  ;;  %449 = vmatprep.subr.mxu1 %v448_v38  ;;  %301 = vmatprep.subr.mxu0 %v2471_v20  ;;  %v2545_v7 = vsub.f32 %v2377_v15, %v2413_v22  ;;  %v3553_v38 = vand.u32 4294901760, %v2505_v35  ;;  %v3554_v15 = vand.u32 4294901760, %v2516_v28 }
  0x39   : > { %v459_v0 = vsub.f32 %v2479_v50, %v3551_v51  ;;  %v465_v9 = vsub.f32 %v2492_v1, %v3552_v62  ;;  %v2541_v51 = vand.u32 4294901760, %v2510_v3  ;;  %303 = vmatpush1.msra.mxu0 %v2482_v55  ;;  %v3445_v62 = vand.u32 4294901760, %v2530_v61 }
  0x3a   : > { %455 = vmatpush1.msra.mxu1 %v454_v14  ;;  %v471_v42 = vsub.f32 %v2505_v35, %v3553_v38  ;;  %305 = vmatprep.subr.mxu0 %v2495_v47  ;;  %v477_v22 = vsub.f32 %v2516_v28, %v3554_v15  ;;  %v2571_v31 = vand.u32 4294901760, %v2547_v63  ;;  %v2575_v15 = vsub.f32 %v2424_v27, %v2457_v8 }
  0x3b   : > { %v460_v54 = vand.u32 4294901760, %v459_v0  ;;  %v466_v37 = vand.u32 4294901760, %v465_v9  ;;  %v2564_v0 = vsub.f32 %v2400_v21, %v2432_v49  ;;  %307 = vmatpush1.msra.mxu0 %v2508_v52  ;;  %v483_v9 = vsub.f32 %v2530_v61, %v3445_v62 }
  0x3c   : > { %v472_v38 = vand.u32 4294901760, %v471_v42  ;;  %v478_v14 = vand.u32 4294901760, %v477_v22  ;;  %309 = vmatprep.subr.mxu0 %v2519_v39  ;;  %v2584_v62 = vsub.f32 %v2434_v56, %v2471_v20  ;;  %v3451_v27 = vand.u32 4294901760, %v2575_v15 }
  0x3d   : > { %461 = vmatprep.subr.mxu1 %v460_v54  ;;  %v3555_v54 = vand.u32 4294901760, %v2545_v7  ;;  %v3448_v21 = vand.u32 4294901760, %v2564_v0  ;;  %v484_v49 = vand.u32 4294901760, %v483_v9  ;;  %311 = vmatpush1.msra.mxu0 %v2541_v51  ;;  %v2592_v22 = vsub.f32 %v2445_v45, %v2482_v55 }
  0x3e   : > { %467 = vmatpush1.msra.mxu1 %v466_v37  ;;  %v2588_v37 = vand.u32 4294901760, %v187_v33  ;;  %313 = vmatprep.subr.mxu0 %v2555_v48  ;;  %v2601_v9 = vsub.f32 %v2463_v40, %v2495_v47  ;;  %v501_v45 = vsub.f32 %v2575_v15, %v3451_v27  ;;  %v3558_v40 = vand.u32 4294901760, %v2584_v62 }
  0x3f   : > { %v489_v42 = vsub.f32 %v2545_v7, %v3555_v54  ;;  %473 = vmatprep.subr.mxu1 %v472_v38  ;;  %v495_v56 = vsub.f32 %v2564_v0, %v3448_v21  ;;  %315 = vmatpush1.msra.mxu0 %v2571_v31  ;;  %v2613_v21 = vsub.f32 %v2473_v34, %v2508_v52  ;;  %v3560_v34 = vand.u32 4294901760, %v2592_v22 }
  0x40   : > { %3556 = vst [vmem:[#allocation23_spill] sm:$0xff] %v2588_v37  ;;  %479 = vmatpush1.msra.mxu1 %v478_v14  ;;  %v2608_v14 = vsub.f32 %v187_v33, %v2588_v37  ;;  %594 = vmatprep.subr.mxu0 %v2254_v19  ;;  %v3458_v47 = vand.u32 4294901760, %v2601_v9  ;;  %v2622_v33 = vsub.f32 %v2484_v30, %v2519_v39  ;;  %v502_v27 = vand.u32 4294901760, %v501_v45 }
  0x41   : > { %v490_v54 = vand.u32 4294901760, %v489_v42  ;;  %485 = vmatprep.subr.mxu1 %v484_v49  ;;  %v496_v38 = vand.u32 4294901760, %v495_v56  ;;  %v507_v49 = vsub.f32 %v2584_v62, %v3558_v40  ;;  %v3459_v56 = vand.u32 4294901760, %v2613_v21 }
  0x42   : > { %3557 = vst [vmem:[#allocation24_spill] sm:$0xff] %v2608_v14  ;;  %v2625_v42 = vand.u32 4294901760, %v2608_v14  ;;  %v519_v52 = vsub.f32 %v2601_v9, %v3458_v47  ;;  %v3465_v55 = vand.u32 4294901760, %v2622_v33  ;;  %v2637_v30 = vsub.f32 %v2510_v3, %v2541_v51 }
  0x43   : > { %491 = vmatpush1.msra.mxu1 %v490_v54  ;;  %v513_v54 = vsub.f32 %v2592_v22, %v3560_v34  ;;  %v508_v40 = vand.u32 4294901760, %v507_v49  ;;  %v2646_v49 = vsub.f32 %v2521_v57, %v2555_v48  ;;  %v2654_v47 = vsub.f32 %v2547_v63, %v2571_v31 }
  0x44   : > { %3559 = vst [vmem:[#allocation25_spill] sm:$0xff] %v2625_v42  ;;  %497 = vmatprep.subr.mxu1 %v496_v38  ;;  %3561 = vst [vmem:[#allocation26_spill] sm:$0xff] %v2637_v30  ;;  %v352_v45 = vsub.f32 %v2608_v14, %v2625_v42  ;;  %v525_v38 = vsub.f32 %v2613_v21, %v3459_v56  ;;  %v520_v34 = vand.u32 4294901760, %v519_v52 }
  0x45   : > { %503 = vmatpush1.msra.mxu1 %v502_v27  ;;  %v514_v39 = vand.u32 4294901760, %v513_v54  ;;  %v531_v3 = vsub.f32 %v2622_v33, %v3465_v55  ;;  %v3464_v27 = vand.u32 4294901760, %v2637_v30  ;;  %3562 = vst [vmem:[#allocation27_spill] sm:$0xff] %v2654_v47  ;;  %v3463_v42 = vand.u32 4294901760, %v2646_v49  ;;  %v3576_v55 = vld [vmem:[#allocation16_spill] sm:$0xff] }
  0x46   : > { %509 = vmatprep.subr.mxu1 %v508_v40  ;;  %v2656_v54 = vand.u32 4294901760, %v352_v45  ;;  %v526_v56 = vand.u32 4294901760, %v525_v38  ;;  %v3462_v40 = vand.u32 4294901760, %v2654_v47 }
  0x47   : > { %515 = vmatpush1.msra.mxu1 %v514_v39  ;;  %v532_v57 = vand.u32 4294901760, %v531_v3  ;;  %v537_v52 = vsub.f32 %v2637_v30, %v3464_v27  ;;  %v543_v63 = vsub.f32 %v2646_v49, %v3463_v42  ;;  %v3565_v3 = vld [vmem:[#allocation5_spill] sm:$0xff]  ;;  %v3574_v42 = vld [vmem:[#allocation14_spill] sm:$0xff]  ;;  %v3575_v27 = vld [vmem:[#allocation15_spill] sm:$0xff] }
  0x48   : > { %3563 = vst [vmem:[#allocation28_spill] sm:$0xff] %v2656_v54  ;;  %521 = vmatprep.subr.mxu1 %v520_v34  ;;  %354 = vmatmul.mubr.f32.vlgmr.msra.gmra.mxu0 %v2656_v54  ;;  %v549_v45 = vsub.f32 %v2654_v47, %v3462_v40  ;;  %v3564_v34 = vmov 0.0   ;;  %v3573_v40 = vld [vmem:[#allocation13_spill] sm:$0xff]  ;;  %v3577_v54 = vand.u32 4294901760, %v2254_v19  ;;  %v3585_v19 = vand.u32 4294901760, %v2296_v36 }
  0x49   : > { %527 = vmatpush1.msra.mxu1 %v526_v56  ;;  %597 = vmatpush1.msra.mxu0 %v2267_v24  ;;  %v538_v39 = vand.u32 4294901760, %v537_v52  ;;  %v544_v38 = vand.u32 4294901760, %v543_v63  ;;  %v3567_v52 = vld [vmem:[#allocation7_spill] sm:$0xff]  ;;  %v3568_v63 = vld [vmem:[#allocation8_spill] sm:$0xff] }
  0x4a   : > { %533 = vmatprep.subr.mxu1 %v532_v57  ;;  %600 = vmatprep.subr.mxu0 %v2273_v26  ;;  %v550_v56 = vand.u32 4294901760, %v549_v45  ;;  %v3566_v57 = vld [vmem:[#allocation6_spill] sm:$0xff] }
  0x4b   : > { %720 = vmatprep.mubr.f32.mxu0 %v3564_v34  ;;  %603 = vmatpush1.msra.mxu0 %v2287_v32  ;;  %v3570_v45 = vld [vmem:[#allocation10_spill] sm:$0xff] }
  0x4c   : > { %539 = vmatpush1.msra.mxu1 %v538_v39  ;;  %606 = vmatprep.subr.mxu0 %v2296_v36  ;;  %v3569_v39 = vld [vmem:[#allocation9_spill] sm:$0xff]  ;;  %v3590_v36 = vand.u32 4294901760, %v2361_v2 }
  0x4d   : > { %545 = vmatprep.subr.mxu1 %v544_v38  ;;  %609 = vmatpush1.msra.mxu0 %v2309_v41  ;;  %v3571_v38 = vld [vmem:[#allocation11_spill] sm:$0xff] }
  0x4e   : > { %551 = vmatpush1.msra.mxu1 %v550_v56  ;;  %612 = vmatprep.subr.mxu0 %v2323_v46  ;;  %v3572_v56 = vld [vmem:[#allocation12_spill] sm:$0xff] }
  0x4f   : > { %586 = vmatmul.mubr.f32.vlgmr.msra.gmra.mxu1 %v2588_v37  ;;  %615 = vmatpush1.msra.mxu0 %v2349_v60  ;;  %v3578_v37 = vld [vmem:[#allocation19_spill] sm:$0xff] }
  0x50   : > { %730 = vmatprep.subr.mxu1 %v2234_v4  ;;  %618 = vmatprep.subr.mxu0 %v2361_v2  ;;  %v3594_v2 = vand.u32 4294901760, %v2410_v59 }
  0x51   : > { %732 = vmatpush1.msra.mxu1 %v2236_v5  ;;  %621 = vmatpush1.msra.mxu0 %v2372_v13 }
  0x52   : > { %734 = vmatprep.subr.mxu1 %v2238_v6  ;;  %624 = vmatprep.subr.mxu0 %v2383_v44 }
  0x53   : > { %736 = vmatpush1.msra.mxu1 %v2240_v10  ;;  %627 = vmatpush1.msra.mxu0 %v2395_v53 }
  0x54   : > { %738 = vmatprep.subr.mxu1 %v2242_v11  ;;  %630 = vmatprep.subr.mxu0 %v2410_v59  ;;  %v3601_v59 = vand.u32 4294901760, %v2516_v28 }
  0x55   : > { %740 = vmatpush1.msra.mxu1 %v2244_v12  ;;  %633 = vmatpush1.msra.mxu0 %v2422_v43 }
  0x56   : > { %742 = vmatprep.subr.mxu1 %v2247_v16  ;;  %636 = vmatprep.subr.mxu0 %v2443_v58 }
  0x57   : > { %744 = vmatpush1.msra.mxu1 %v2249_v17  ;;  %639 = vmatpush1.msra.mxu0 %v2461_v29 }
  0x58   : > { %746 = vmatprep.subr.mxu1 %v2251_v18  ;;  %642 = vmatprep.subr.mxu0 %v2479_v50 }
  0x59   : > { %748 = vmatpush1.msra.mxu1 %v2264_v23  ;;  %645 = vmatpush1.msra.mxu0 %v2492_v1 }
  0x5a   : > { %750 = vmatprep.subr.mxu1 %v2270_v25  ;;  %648 = vmatprep.subr.mxu0 %v2505_v35 }
  0x5b   : > { %752 = vmatpush1.msra.mxu1 %v3565_v3  ;;  %651 = vmatpush1.msra.mxu0 %v2516_v28  ;;  %v238_v28 = vld [vmem:[#allocation2 + $0x190] sm:$0xff] }
  0x5c   : > { %754 = vmatprep.subr.mxu1 %v3566_v57  ;;  %654 = vmatprep.subr.mxu0 %v2530_v61 }
  0x5d   : > { %756 = vmatpush1.msra.mxu1 %v3567_v52  ;;  %657 = vmatpush1.msra.mxu0 %v2545_v7 }
  0x5e   : > { %758 = vmatprep.subr.mxu1 %v3568_v63  ;;  %660 = vmatprep.subr.mxu0 %v2564_v0 }
  0x5f   : > { %760 = vmatpush1.msra.mxu1 %v3569_v39  ;;  %663 = vmatpush1.msra.mxu0 %v2575_v15 }
  0x60   : > { %762 = vmatprep.subr.mxu1 %v3570_v45  ;;  %666 = vmatprep.subr.mxu0 %v2584_v62 }
  0x61   : > { %764 = vmatpush1.msra.mxu1 %v3571_v38  ;;  %669 = vmatpush1.msra.mxu0 %v2592_v22 }
  0x62   : > { %766 = vmatprep.subr.mxu1 %v3572_v56  ;;  %672 = vmatprep.subr.mxu0 %v2601_v9 }
  0x63   : > { %768 = vmatpush1.msra.mxu1 %v3573_v40  ;;  %675 = vmatpush1.msra.mxu0 %v2613_v21 }
  0x64   : > { %770 = vmatprep.subr.mxu1 %v3574_v42  ;;  %678 = vmatprep.subr.mxu0 %v2622_v33 }
  0x65   : > { %772 = vmatpush1.msra.mxu1 %v3575_v27  ;;  %681 = vmatpush1.msra.mxu0 %v2637_v30  ;;  %v3579_v27 = vand.u32 4294901760, %v2267_v24  ;;  %v3580_v30 = vld [vmem:[#allocation20_spill] sm:$0xff]  ;;  %v3586_v24 = vand.u32 4294901760, %v2309_v41  ;;  %v3591_v41 = vand.u32 4294901760, %v2372_v13  ;;  %v250_v13 = vld [vmem:[#allocation2 + $0x1f0] sm:$0xff] }
  0x66   : > { %774 = vmatprep.subr.mxu1 %v3576_v55  ;;  %684 = vmatprep.subr.mxu0 %v2646_v49  ;;  %v3581_v55 = vand.u32 4294901760, %v2273_v26  ;;  %v3587_v26 = vand.u32 4294901760, %v2323_v46  ;;  %v3592_v46 = vand.u32 4294901760, %v2383_v44  ;;  %v3597_v44 = vand.u32 4294901760, %v2461_v29  ;;  %v242_v29 = vld [vmem:[#allocation2 + $0x1b0] sm:$0xff] }
  0x67   : > { %776 = vmatpush1.msra.mxu1 %v2457_v8  ;;  %687 = vmatpush1.msra.mxu0 %v2654_v47  ;;  %v3582_v8 = vld [vmem:[#allocation21_spill] sm:$0xff]  ;;  %v3583_v47 = vand.u32 4294901760, %v2287_v32  ;;  %v3588_v32 = vand.u32 4294901760, %v2349_v60  ;;  %v3593_v60 = vand.u32 4294901760, %v2395_v53  ;;  %v3600_v53 = vand.u32 4294901760, %v2505_v35 }
  0x68   : > { %778 = vmatprep.subr.mxu1 %v2471_v20  ;;  %723 = vmatmul.mubr.f32.vlgmr.msra.gmra.mxu0 %v2608_v14  ;;  %v3584_v20 = vld [vmem:[#allocation22_spill] sm:$0xff]  ;;  %v3603_v35 = vand.u32 4294901760, %v2545_v7 }
  0x69   : > { %838 = vmatprep.subr.mxu0 %v3577_v54  ;;  %780 = vmatpush1.msra.mxu1 %v3578_v37  ;;  %v2821_v54 = vand.u32 4294901760, %v242_v29 }
  0x6a   : > { %842 = vmatpush1.msra.mxu0 %v3579_v27  ;;  %782 = vmatprep.subr.mxu1 %v3580_v30  ;;  %v3605_v27 = vand.u32 4294901760, %v2575_v15  ;;  %v235_v15 = vld [vmem:[#allocation2 + $0x178] sm:$0xff] }
  0x6b   : > { %846 = vmatprep.subr.mxu0 %v3581_v55  ;;  %784 = vmatpush1.msra.mxu1 %v3582_v8  ;;  %v3589_v55 = vld [vmem:[#allocation25_spill] sm:$0xff]  ;;  %3606 = vst [vmem:[#allocation5_spill] sm:$0xff] %v2821_v54 }
  0x6c   : > { %850 = vmatpush1.msra.mxu0 %v3583_v47  ;;  %786 = vmatprep.subr.mxu1 %v3584_v20 }
  0x6d   : > { %854 = vmatprep.subr.mxu0 %v3585_v19  ;;  %788 = vmatpush1.msra.mxu1 %v2541_v51 }
  0x6e   : > { %858 = vmatpush1.msra.mxu0 %v3586_v24  ;;  %790 = vmatprep.subr.mxu1 %v2555_v48 }
  0x6f   : > { %862 = vmatprep.subr.mxu0 %v3587_v26  ;;  %792 = vmatpush1.msra.mxu1 %v2571_v31  ;;  %v3610_v26 = vand.u32 4294901760, %v2601_v9 }
  0x70   : > { %825 = vmatprep.mubr.f32.mxu1 %v3564_v34  ;;  %866 = vmatpush1.msra.mxu0 %v3588_v32 }
  0x71   : > { %829 = vmatmul.mubr.f32.vlgmr.msra.gmra.mxu1 %v3589_v55  ;;  %870 = vmatprep.subr.mxu0 %v3590_v36  ;;  %v3612_v36 = vand.u32 4294901760, %v2613_v21  ;;  %v226_v21 = vld [vmem:[#allocation2 + $0x130] sm:$0xff] }
  0x72   : > { %1004 = vmatprep.subr.mxu1 %v2234_v4  ;;  %874 = vmatpush1.msra.mxu0 %v3591_v41  ;;  %v3595_v4 = vand.u32 4294901760, %v2422_v43  ;;  %v2849_v41 = vsub.f32 %v242_v29, %v2821_v54 }
  0x73   : > { %1006 = vmatpush1.msra.mxu1 %v2236_v5  ;;  %878 = vmatprep.subr.mxu0 %v3592_v46  ;;  %v3596_v5 = vand.u32 4294901760, %v2443_v58 }
  0x74   : > { %1008 = vmatprep.subr.mxu1 %v2238_v6  ;;  %882 = vmatpush1.msra.mxu0 %v3593_v60  ;;  %v251_v6 = vld [vmem:[#allocation2 + $0x1f8] sm:$0xff]  ;;  %v2859_v60 = vand.u32 4294901760, %v235_v15  ;;  %v3473_v29 = vand.u32 4294901760, %v2849_v41 }
  0x75   : > { %1010 = vmatpush1.msra.mxu1 %v2240_v10  ;;  %886 = vmatprep.subr.mxu0 %v3594_v2  ;;  %v246_v10 = vld [vmem:[#allocation2 + $0x1d0] sm:$0xff]  ;;  %v2784_v43 = vand.u32 4294901760, %v251_v6 }
  0x76   : > { %1012 = vmatprep.subr.mxu1 %v2242_v11  ;;  %890 = vmatpush1.msra.mxu0 %v3595_v4  ;;  %v3598_v11 = vand.u32 4294901760, %v2479_v50  ;;  %v2791_v58 = vand.u32 4294901760, %v246_v10  ;;  %3615 = vst [vmem:[#allocation9_spill] sm:$0xff] %v2859_v60  ;;  %v3617_v4 = vld [vmem:[#allocation26_spill] sm:$0xff] }
  0x77   : > { %1014 = vmatpush1.msra.mxu1 %v2244_v12  ;;  %894 = vmatprep.subr.mxu0 %v3596_v5  ;;  %v3599_v12 = vand.u32 4294901760, %v2492_v1  ;;  %v2808_v1 = vsub.f32 %v251_v6, %v2784_v43  ;;  %v3619_v5 = vld [vmem:[#allocation15_spill] sm:$0xff] }
  0x78   : > { %1016 = vmatprep.subr.mxu1 %v2247_v16  ;;  %898 = vmatpush1.msra.mxu0 %v3597_v44  ;;  %v2786_v16 = vand.u32 4294901760, %v250_v13  ;;  %v2814_v47 = vsub.f32 %v246_v10, %v2791_v58  ;;  %v227_v44 = vld [vmem:[#allocation2 + $0x138] sm:$0xff]  ;;  %v3621_v10 = vand.u32 4294901760, %v2646_v49 }
  0x79   : > { %1018 = vmatpush1.msra.mxu1 %v2249_v17  ;;  %902 = vmatprep.subr.mxu0 %v3598_v11  ;;  %v247_v17 = vld [vmem:[#allocation2 + $0x1d8] sm:$0xff]  ;;  %v3479_v19 = vand.u32 4294901760, %v2808_v1 }
  0x7a   : > { %1020 = vmatprep.subr.mxu1 %v2251_v18  ;;  %906 = vmatpush1.msra.mxu0 %v3599_v12  ;;  %v243_v18 = vld [vmem:[#allocation2 + $0x1b8] sm:$0xff]  ;;  %v2805_v50 = vand.u32 4294901760, %v247_v17  ;;  %v3475_v32 = vand.u32 4294901760, %v2814_v47 }
  0x7b   : > { %1022 = vmatpush1.msra.mxu1 %v2264_v23  ;;  %910 = vmatprep.subr.mxu0 %v3600_v53  ;;  %v3602_v23 = vand.u32 4294901760, %v2530_v61  ;;  %v3604_v61 = vand.u32 4294901760, %v2564_v0  ;;  %v2816_v7 = vand.u32 4294901760, %v243_v18  ;;  %v2826_v0 = vand.u32 4294901760, %v238_v28  ;;  %v3622_v11 = vld [vmem:[#allocation16_spill] sm:$0xff] }
  0x7c   : > { %1024 = vmatprep.subr.mxu1 %v2270_v25  ;;  %914 = vmatpush1.msra.mxu0 %v3601_v59  ;;  %v2803_v25 = vsub.f32 %v250_v13, %v2786_v16  ;;  %v2834_v24 = vsub.f32 %v247_v17, %v2805_v50  ;;  %v2885_v12 = vsub.f32 %v2814_v47, %v3475_v32  ;;  %v3623_v59 = vld [vmem:[#allocation27_spill] sm:$0xff] }
  0x7d   : > { %1026 = vmatpush1.msra.mxu1 %v3565_v3  ;;  %918 = vmatprep.subr.mxu0 %v3602_v23  ;;  %v239_v3 = vld [vmem:[#allocation2 + $0x198] sm:$0xff]  ;;  %3608 = vst [vmem:[#allocation6_spill] sm:$0xff] %v2826_v0  ;;  %v2857_v46 = vsub.f32 %v238_v28, %v2826_v0  ;;  %v2897_v23 = vand.u32 4294901760, %v226_v21  ;;  %v3626_v28 = vld [vmem:[#allocation17_spill] sm:$0xff] }
  0x7e   : > { %1028 = vmatprep.subr.mxu1 %v3566_v57  ;;  %922 = vmatpush1.msra.mxu0 %v3603_v35  ;;  %v3607_v57 = vand.u32 4294901760, %v2584_v62  ;;  %v230_v62 = vld [vmem:[#allocation2 + $0x150] sm:$0xff]  ;;  %v3476_v13 = vand.u32 4294901760, %v2834_v24  ;;  %v223_v35 = vld [vmem:[#allocation2 + $0x118] sm:$0xff] }
  0x7f   : > { %1030 = vmatpush1.msra.mxu1 %v3567_v52  ;;  %926 = vmatprep.subr.mxu0 %v3604_v61  ;;  %v234_v52 = vld [vmem:[#allocation2 + $0x170] sm:$0xff]  ;;  %v2861_v2 = vand.u32 4294901760, %v230_v62  ;;  %3625 = vst [vmem:[#allocation12_spill] sm:$0xff] %v2897_v23 }
  0x80   : > { %1032 = vmatprep.subr.mxu1 %v3568_v63  ;;  %930 = vmatpush1.msra.mxu0 %v3605_v27  ;;  %v3609_v63 = vand.u32 4294901760, %v2592_v22  ;;  %v231_v22 = vld [vmem:[#allocation2 + $0x158] sm:$0xff]  ;;  %v2851_v9 = vand.u32 4294901760, %v234_v52  ;;  %v3627_v61 = vld [vmem:[#allocation23_spill] sm:$0xff] }
  0x81   : > { %1034 = vmatpush1.msra.mxu1 %v3569_v39  ;;  %934 = vmatprep.subr.mxu0 %v3607_v57  ;;  %v3478_v39 = vand.u32 4294901760, %v2803_v25  ;;  %3616 = vst [vmem:[#allocation10_spill] sm:$0xff] %v2861_v2  ;;  %v2876_v6 = vand.u32 4294901760, %v231_v22  ;;  %v2903_v27 = vsub.f32 %v230_v62, %v2861_v2  ;;  %v222_v57 = vld [vmem:[#allocation2 + $0x110] sm:$0xff]  ;;  %v2918_v62 = vsub.f32 %v2834_v24, %v3476_v13 }
  0x82   : > { %1036 = vmatprep.subr.mxu1 %v3570_v45  ;;  %938 = vmatpush1.msra.mxu0 %v3609_v63  ;;  %v2839_v45 = vand.u32 4294901760, %v239_v3  ;;  %3613 = vst [vmem:[#allocation8_spill] sm:$0xff] %v2851_v9  ;;  %v2895_v49 = vsub.f32 %v234_v52, %v2851_v9  ;;  %v3477_v63 = vand.u32 4294901760, %v2857_v46  ;;  %v2909_v52 = vsub.f32 %v235_v15, %v2859_v60  ;;  %v211_v15 = vld [vmem:[#allocation2 + $0xb8] sm:$0xff] }
  0x83   : > { %1038 = vmatpush1.msra.mxu1 %v3571_v38  ;;  %942 = vmatprep.subr.mxu0 %v3610_v26  ;;  %v2843_v38 = vsub.f32 %v243_v18, %v2816_v7  ;;  %3620 = vst [vmem:[#allocation11_spill] sm:$0xff] %v2876_v6  ;;  %v3624_v18 = vand.u32 4294901760, %v3623_v59  ;;  %v3629_v26 = vld [vmem:[#allocation18_spill] sm:$0xff]  ;;  %v2944_v59 = vand.u32 4294901760, %v222_v57  ;;  %v3023_v14 = vand.u32 4294901760, %v211_v15 }
  0x84   : > { %1040 = vmatprep.subr.mxu1 %v3572_v56  ;;  %3611 = vst [vmem:[#allocation7_spill] sm:$0xff] %v2839_v45  ;;  %946 = vmatpush1.msra.mxu0 %v3612_v36  ;;  %v3614_v56 = vand.u32 4294901760, %v2622_v33  ;;  %v2869_v33 = vsub.f32 %v2808_v1, %v3479_v19  ;;  %v2889_v17 = vsub.f32 %v239_v3, %v2839_v45  ;;  %v2905_v3 = vand.u32 4294901760, %v227_v44 }
  0x85   : > { %1042 = vmatpush1.msra.mxu1 %v3573_v40  ;;  %v3618_v40 = vand.u32 4294901760, %v3617_v4  ;;  %v3474_v53 = vand.u32 4294901760, %v2843_v38  ;;  %995 = vmatprep.mubr.f32.mxu0 %v3564_v34  ;;  %v218_v4 = vld [vmem:[#allocation2 + $0xf0] sm:$0xff]  ;;  %3631 = vst [vmem:[#allocation19_spill] sm:$0xff] %v2944_v59  ;;  %v2984_v19 = vsub.f32 %v222_v57, %v2944_v59  ;;  %3638 = vst [vmem:[#allocation27_spill] sm:$0xff] %v3023_v14 }
  0x86   : > { %950 = vmatprep.subr.mxu0 %v3614_v56  ;;  %1044 = vmatprep.subr.mxu1 %v3574_v42  ;;  %v2874_v42 = vsub.f32 %v2803_v25, %v3478_v39  ;;  %3628 = vst [vmem:[#allocation13_spill] sm:$0xff] %v2905_v3  ;;  %v1219_v36 = vand.u32 4294901760, %v2869_v33  ;;  %v2931_v33 = vand.u32 4294901760, %v223_v35  ;;  %v206_v56 = vld [vmem:[#allocation2 + $0x90] sm:$0xff] }
  0x87   : > { %954 = vmatpush1.msra.mxu0 %v3618_v40  ;;  %1046 = vmatpush1.msra.mxu1 %v3619_v5  ;;  %v2921_v40 = vsub.f32 %v231_v22, %v2876_v6  ;;  %v2929_v5 = vsub.f32 %v2843_v38, %v3474_v53  ;;  %v2942_v22 = vsub.f32 %v2849_v41, %v3473_v29  ;;  %v215_v29 = vld [vmem:[#allocation2 + $0xd8] sm:$0xff] }
  0x88   : > { %958 = vmatprep.subr.mxu0 %v3621_v10  ;;  %1048 = vmatprep.subr.mxu1 %v3622_v11  ;;  %3630 = vst [vmem:[#allocation14_spill] sm:$0xff] %v2931_v33  ;;  %v3480_v10 = vand.u32 4294901760, %v2889_v17  ;;  %v214_v11 = vld [vmem:[#allocation2 + $0xd0] sm:$0xff]  ;;  %v2958_v53 = vsub.f32 %v227_v44, %v2905_v3  ;;  %3636 = vst [vmem:[#allocation15_spill] sm:$0xff] %v2984_v19 }
  0x89   : > { %962 = vmatpush1.msra.mxu0 %v3624_v18  ;;  %1050 = vmatpush1.msra.mxu1 %v3626_v28  ;;  %v219_v18 = vld [vmem:[#allocation2 + $0xf8] sm:$0xff]  ;;  %v3481_v28 = vand.u32 4294901760, %v2895_v49  ;;  %v3484_v32 = vand.u32 4294901760, %v2921_v40  ;;  %v2964_v13 = vand.u32 4294901760, %v214_v11  ;;  %v1243_v39 = vand.u32 4294901760, %v2929_v5 }
  0x8a   : > { %997 = vmatmul.mubr.f32.vlgmr.msra.gmra.mxu0 %v3627_v61  ;;  %1052 = vmatprep.subr.mxu1 %v3629_v26  ;;  %v2955_v26 = vand.u32 4294901760, %v218_v4  ;;  %v2975_v44 = vand.u32 4294901760, %v219_v18 }
  0x8b   : > { %1108 = vmatprep.subr.mxu0 %v2784_v43  ;;  %1054 = vmatpush1.msra.mxu1 %v3578_v37  ;;  %v2937_v37 = vsub.f32 %v226_v21, %v2897_v23  ;;  %v3482_v21 = vand.u32 4294901760, %v2909_v52  ;;  %3633 = vst [vmem:[#allocation21_spill] sm:$0xff] %v2964_v13  ;;  %v2989_v5 = vsub.f32 %v2895_v49, %v3481_v28  ;;  %v210_v28 = vld [vmem:[#allocation2 + $0xb0] sm:$0xff] }
  0x8c   : > { %1110 = vmatpush1.msra.mxu0 %v2786_v16  ;;  %1056 = vmatprep.subr.mxu1 %v3580_v30  ;;  %v2952_v30 = vsub.f32 %v2857_v46, %v3477_v63  ;;  %3632 = vst [vmem:[#allocation20_spill] sm:$0xff] %v2955_v26  ;;  %v3487_v63 = vand.u32 4294901760, %v2903_v27  ;;  %3634 = vst [vmem:[#allocation22_spill] sm:$0xff] %v2975_v44  ;;  %v3002_v57 = vsub.f32 %v218_v4, %v2955_v26 }
  0x8d   : > { %1112 = vmatprep.subr.mxu0 %v2805_v50  ;;  %1058 = vmatpush1.msra.mxu1 %v3582_v8  ;;  %v1231_v8 = vand.u32 4294901760, %v2918_v62  ;;  %v2978_v62 = vsub.f32 %v223_v35, %v2931_v33  ;;  %v2999_v35 = vsub.f32 %v2909_v52, %v3482_v21  ;;  %v1273_v21 = vand.u32 4294901760, %v2989_v5 }
  0x8e   : > { %1114 = vmatpush1.msra.mxu0 %v2791_v58  ;;  %1060 = vmatprep.subr.mxu1 %v3584_v20  ;;  %v2973_v20 = vsub.f32 %v2889_v17, %v3480_v10  ;;  %v2991_v10 = vand.u32 4294901760, %v215_v29  ;;  %v3018_v4 = vsub.f32 %v2903_v27, %v3487_v63  ;;  %v3639_v63 = vand.u32 4294901760, %v2874_v42 }
  0x8f   : > { %1116 = vmatprep.subr.mxu0 %v2816_v7  ;;  %1062 = vmatpush1.msra.mxu1 %v2541_v51  ;;  %3635 = vst [vmem:[#allocation26_spill] sm:$0xff] %v2978_v62  ;;  %v1249_v51 = vand.u32 4294901760, %v2942_v22  ;;  %v207_v22 = vld [vmem:[#allocation2 + $0x98] sm:$0xff]  ;;  %v3643_v5 = vand.u32 4294901760, %v2885_v12 }
  0x90   : > { %1118 = vmatpush1.msra.mxu0 %v2821_v54  ;;  %1064 = vmatprep.subr.mxu1 %v2555_v48  ;;  %3637 = vst [vmem:[#allocation16_spill] sm:$0xff] %v2991_v10  ;;  %v1261_v48 = vand.u32 4294901760, %v2952_v30  ;;  %v3013_v30 = vsub.f32 %v214_v11, %v2964_v13  ;;  %v1255_v55 = vand.u32 4294901760, %v2973_v20  ;;  %v3027_v11 = vsub.f32 %v219_v18, %v2975_v44  ;;  %v198_v54 = vld [vmem:[#allocation2 + $0x50] sm:$0xff] }
  0x91   : > { %1120 = vmatprep.subr.mxu0 %v2839_v45  ;;  %1066 = vmatpush1.msra.mxu1 %v2571_v31  ;;  %v3010_v31 = vsub.f32 %v2921_v40, %v3484_v32  ;;  %v3033_v45 = vand.u32 4294901760, %v210_v28  ;;  %v1267_v18 = vand.u32 4294901760, %v2999_v35  ;;  %v3642_v32 = vand.u32 4294901760, %v2958_v53 }
  0x92   : > { %1099 = vmatprep.mubr.f32.mxu1 %v3564_v34  ;;  %1122 = vmatpush1.msra.mxu0 %v2826_v0  ;;  %v202_v0 = vld [vmem:[#allocation2 + $0x70] sm:$0xff]  ;;  %v3045_v42 = vand.u32 4294901760, %v207_v22  ;;  %v3644_v35 = vand.u32 4294901760, %v2937_v37 }
  0x93   : > { %1101 = vmatmul.mubr.f32.vlgmr.msra.gmra.mxu1 %v3627_v61  ;;  %1124 = vmatprep.subr.mxu0 %v2859_v60  ;;  %3640 = vst [vmem:[#allocation17_spill] sm:$0xff] %v3033_v45  ;;  %v203_v60 = vld [vmem:[#allocation2 + $0x78] sm:$0xff]  ;;  %v1279_v20 = vand.u32 4294901760, %v3010_v31 }
  0x94   : > { %1220 = vmatprep.subr.mxu1 %v1219_v36  ;;  %1126 = vmatpush1.msra.mxu0 %v2851_v9  ;;  %v3035_v36 = vand.u32 4294901760, %v206_v56  ;;  %v3043_v9 = vsub.f32 %v2958_v53, %v3642_v32  ;;  %v3060_v32 = vand.u32 4294901760, %v202_v0 }
  0x95   : > { %1226 = vmatpush1.msra.mxu1 %v3639_v63  ;;  %1128 = vmatprep.subr.mxu0 %v2876_v6  ;;  %v3048_v63 = vsub.f32 %v215_v29, %v2991_v10  ;;  %v3058_v6 = vsub.f32 %v2937_v37, %v3644_v35  ;;  %v3645_v29 = vand.u32 4294901760, %v2978_v62  ;;  %v3076_v35 = vsub.f32 %v210_v28, %v3033_v45  ;;  %v195_v28 = vld [vmem:[#allocation2 + $0x38] sm:$0xff] }
  0x96   : > { %3641 = vst [vmem:[#allocation18_spill] sm:$0xff] %v3035_v36  ;;  %1232 = vmatprep.subr.mxu1 %v1231_v8  ;;  %1130 = vmatpush1.msra.mxu0 %v2861_v2  ;;  %v1285_v8 = vand.u32 4294901760, %v3018_v4  ;;  %v199_v4 = vld [vmem:[#allocation2 + $0x58] sm:$0xff]  ;;  %v3072_v2 = vsub.f32 %v211_v15, %v3023_v14  ;;  %v1291_v15 = vand.u32 4294901760, %v3043_v9  ;;  %v194_v9 = vld [vmem:[#allocation2 + $0x30] sm:$0xff] }
  0x97   : > { %1238 = vmatpush1.msra.mxu1 %v3643_v5  ;;  %1132 = vmatprep.subr.mxu0 %v2905_v3  ;;  %v3066_v12 = vsub.f32 %v2978_v62, %v3645_v29  ;;  %v3068_v5 = vand.u32 4294901760, %v203_v60  ;;  %v3647_v29 = vand.u32 4294901760, %v2984_v19  ;;  %v3098_v62 = vand.u32 4294901760, %v199_v4 }
  0x98   : > { %1244 = vmatprep.subr.mxu1 %v1243_v39  ;;  %1134 = vmatpush1.msra.mxu0 %v2897_v23  ;;  %v3079_v39 = vsub.f32 %v206_v56, %v3035_v36  ;;  %v3091_v23 = vsub.f32 %v207_v22, %v3045_v42  ;;  %v1297_v56 = vand.u32 4294901760, %v3058_v6  ;;  %v3648_v22 = vand.u32 4294901760, %v3027_v11  ;;  %v191_v6 = vld [vmem:[#allocation2 + $0x18] sm:$0xff] }
  0x99   : > { %1250 = vmatpush1.msra.mxu1 %v1249_v51  ;;  %v1308_v3 = vsub.f32 %v2984_v19, %v3647_v29  ;;  %1136 = vmatprep.subr.mxu0 %v2931_v33  ;;  %v3088_v51 = vand.u32 4294901760, %v198_v54  ;;  %v3096_v29 = vsub.f32 %v202_v0, %v3060_v32  ;;  %v1303_v31 = vand.u32 4294901760, %v3066_v12  ;;  %v190_v19 = vld [vmem:[#allocation2 + $0x10] sm:$0xff] }
  0x9a   : > { %3646 = vst [vmem:[#allocation29_spill] sm:$0xff] %v3079_v39  ;;  %1256 = vmatprep.subr.mxu1 %v1255_v55  ;;  %1138 = vmatpush1.msra.mxu0 %v2944_v59  ;;  %v1314_v59 = vsub.f32 %v3027_v11, %v3648_v22  ;;  %v3108_v0 = vsub.f32 %v203_v60, %v3068_v5  ;;  %v3649_v33 = vand.u32 4294901760, %v3002_v57  ;;  %v3650_v22 = vand.u32 4294901760, %v3048_v63 }
  0x9b   : > { %1262 = vmatpush1.msra.mxu1 %v1261_v48  ;;  %1140 = vmatprep.subr.mxu0 %v2975_v44  ;;  %v1309_v55 = vand.u32 4294901760, %v1308_v3  ;;  %v3114_v44 = vand.u32 4294901760, %v195_v28  ;;  %v3122_v48 = vsub.f32 %v198_v54, %v3088_v51  ;;  %v3124_v3 = vand.u32 4294901760, %v194_v9 }
  0x9c   : > { %1268 = vmatprep.subr.mxu1 %v1267_v18  ;;  %1142 = vmatpush1.msra.mxu0 %v2955_v26  ;;  %v1320_v18 = vsub.f32 %v3002_v57, %v3649_v33  ;;  %v1326_v60 = vsub.f32 %v3048_v63, %v3650_v22  ;;  %v3652_v33 = vand.u32 4294901760, %v3013_v30  ;;  %v3135_v22 = vsub.f32 %v199_v4, %v3098_v62 }
  0x9d   : > { %1274 = vmatpush1.msra.mxu1 %v1273_v21  ;;  %1144 = vmatprep.subr.mxu0 %v2991_v10  ;;  %3651 = vst [vmem:[#allocation30_spill] sm:$0xff] %v3122_v48  ;;  %v3131_v10 = vand.u32 4294901760, %v191_v6  ;;  %v1315_v54 = vand.u32 4294901760, %v1314_v59  ;;  %v3653_v21 = vand.u32 4294901760, %v3072_v2 }
  0x9e   : > { %1280 = vmatprep.subr.mxu1 %v1279_v20  ;;  %1146 = vmatpush1.msra.mxu0 %v2964_v13  ;;  %v1332_v12 = vsub.f32 %v3013_v30, %v3652_v33  ;;  %v1321_v33 = vand.u32 4294901760, %v1320_v18  ;;  %v3654_v20 = vand.u32 4294901760, %v3076_v35  ;;  %v1327_v59 = vand.u32 4294901760, %v1326_v60 }
  0x9f   : > { %1286 = vmatpush1.msra.mxu1 %v1285_v8  ;;  %1148 = vmatprep.subr.mxu0 %v3023_v14  ;;  %v1338_v13 = vsub.f32 %v3072_v2, %v3653_v21  ;;  %v3141_v8 = vand.u32 4294901760, %v190_v19  ;;  %v3149_v14 = vsub.f32 %v195_v28, %v3114_v44  ;;  %v3655_v21 = vand.u32 4294901760, %v3091_v23 }
  0xa0   : > { %1292 = vmatprep.subr.mxu1 %v1291_v15  ;;  %1150 = vmatpush1.msra.mxu0 %v3033_v45  ;;  %v1344_v4 = vsub.f32 %v3076_v35, %v3654_v20  ;;  %v3153_v15 = vsub.f32 %v194_v9, %v3124_v3  ;;  %v1333_v18 = vand.u32 4294901760, %v1332_v12  ;;  %v3656_v28 = vand.u32 4294901760, %v3079_v39 }
  0xa1   : > { %1298 = vmatpush1.msra.mxu1 %v1297_v56  ;;  %1152 = vmatprep.subr.mxu0 %v3045_v42  ;;  %v1350_v26 = vsub.f32 %v3091_v23, %v3655_v21  ;;  %v3165_v60 = vsub.f32 %v191_v6, %v3131_v10  ;;  %v1339_v9 = vand.u32 4294901760, %v1338_v13  ;;  %v3169_v21 = vsub.f32 %v190_v19, %v3141_v8 }
  0xa2   : > { %1304 = vmatprep.subr.mxu1 %v1303_v31  ;;  %1154 = vmatpush1.msra.mxu0 %v3035_v36  ;;  %v1356_v20 = vsub.f32 %v3079_v39, %v3656_v28  ;;  %v3658_v56 = vand.u32 4294901760, %v3108_v0  ;;  %v1345_v28 = vand.u32 4294901760, %v1344_v4  ;;  %v3524_v6 = vand.u32 4294901760, %v3149_v14 }
  0xa3   : > { %1310 = vmatpush1.msra.mxu1 %v1309_v55  ;;  %1156 = vmatprep.subr.mxu0 %v3068_v5  ;;  %3657 = vst [vmem:[#allocation31_spill] sm:$0xff] %v3169_v21  ;;  %v3659_v13 = vand.u32 4294901760, %v3096_v29  ;;  %v3660_v12 = vand.u32 4294901760, %v3135_v22  ;;  %v3523_v4 = vand.u32 4294901760, %v3165_v60  ;;  %v3522_v31 = vand.u32 4294901760, %v3169_v21 }
  0xa4   : > { %1316 = vmatprep.subr.mxu1 %v1315_v54  ;;  %v1362_v55 = vsub.f32 %v3108_v0, %v3658_v56  ;;  %1158 = vmatpush1.msra.mxu0 %v3060_v32  ;;  %v1351_v54 = vand.u32 4294901760, %v1350_v26  ;;  %v1357_v56 = vand.u32 4294901760, %v1356_v20 }
  0xa5   : > { %1322 = vmatpush1.msra.mxu1 %v1321_v33  ;;  %1160 = vmatprep.subr.mxu0 %v3098_v62  ;;  %v1368_v19 = vsub.f32 %v3096_v29, %v3659_v13  ;;  %v1374_v33 = vsub.f32 %v3135_v22, %v3660_v12 }
  0xa6   : > { %1328 = vmatprep.subr.mxu1 %v1327_v59  ;;  %1162 = vmatpush1.msra.mxu0 %v3088_v51  ;;  %v1363_v26 = vand.u32 4294901760, %v1362_v55  ;;  %v3661_v59 = vand.u32 4294901760, %v3122_v48 }
  0xa7   : > { %1334 = vmatpush1.msra.mxu1 %v1333_v18  ;;  %1164 = vmatprep.subr.mxu0 %v3114_v44  ;;  %v1386_v18 = vsub.f32 %v3149_v14, %v3524_v6  ;;  %v1369_v20 = vand.u32 4294901760, %v1368_v19  ;;  %v1375_v12 = vand.u32 4294901760, %v1374_v33  ;;  %v3663_v19 = vld [vmem:[#allocation28_spill] sm:$0xff] }
  0xa8   : > { %1340 = vmatprep.subr.mxu1 %v1339_v9  ;;  %v1380_v13 = vsub.f32 %v3122_v48, %v3661_v59  ;;  %1166 = vmatpush1.msra.mxu0 %v3124_v3  ;;  %v3662_v9 = vand.u32 4294901760, %v3153_v15  ;;  %v3679_v6 = vld [vmem:[#allocation16_spill] sm:$0xff] }
  0xa9   : > { %1346 = vmatpush1.msra.mxu1 %v1345_v28  ;;  %1168 = vmatprep.subr.mxu0 %v3131_v10  ;;  %v1398_v28 = vsub.f32 %v3165_v60, %v3523_v4  ;;  %v3678_v4 = vld [vmem:[#allocation20_spill] sm:$0xff] }
  0xaa   : > { %1352 = vmatprep.subr.mxu1 %v1351_v54  ;;  %v1392_v55 = vsub.f32 %v3153_v15, %v3662_v9  ;;  %1170 = vmatpush1.msra.mxu0 %v3141_v8  ;;  %v1381_v59 = vand.u32 4294901760, %v1380_v13  ;;  %v1404_v54 = vsub.f32 %v3169_v21, %v3522_v31  ;;  %v1387_v9 = vand.u32 4294901760, %v1386_v18  ;;  %v3664_v13 = vld [vmem:[#allocation5_spill] sm:$0xff]  ;;  %v3665_v18 = vld [vmem:[#allocation26_spill] sm:$0xff] }
  0xab   : > { %1358 = vmatpush1.msra.mxu1 %v1357_v56  ;;  %1203 = vmatprep.mubr.f32.mxu0 %v3564_v34  ;;  %v1399_v33 = vand.u32 4294901760, %v1398_v28  ;;  %v3669_v28 = vld [vmem:[#allocation9_spill] sm:$0xff]  ;;  %v3677_v31 = vld [vmem:[#allocation22_spill] sm:$0xff] }
  0xac   : > { %1364 = vmatprep.subr.mxu1 %v1363_v26  ;;  %1449 = vmatprep.subr.mxu0 %v2808_v1  ;;  %v1393_v56 = vand.u32 4294901760, %v1392_v55  ;;  %v1405_v26 = vand.u32 4294901760, %v1404_v54  ;;  %v3667_v55 = vld [vmem:[#allocation15_spill] sm:$0xff] }
  0xad   : > { %1209 = vmatmul.mubr.f32.vlgmr.msra.gmra.mxu0 %v3663_v19  ;;  %1370 = vmatpush1.msra.mxu1 %v1369_v20  ;;  %v3666_v20 = vld [vmem:[#allocation7_spill] sm:$0xff]  ;;  %v3672_v19 = vld [vmem:[#allocation10_spill] sm:$0xff] }
  0xae   : > { %1452 = vmatpush1.msra.mxu0 %v2803_v25  ;;  %1376 = vmatprep.subr.mxu1 %v1375_v12  ;;  %v3668_v12 = vld [vmem:[#allocation6_spill] sm:$0xff]  ;;  %v3671_v54 = vld [vmem:[#allocation11_spill] sm:$0xff] }
  0xaf   : > { %1455 = vmatprep.subr.mxu0 %v2834_v24  ;;  %1382 = vmatpush1.msra.mxu1 %v1381_v59  ;;  %v3670_v59 = vld [vmem:[#allocation8_spill] sm:$0xff] }
  0xb0   : > { %1458 = vmatpush1.msra.mxu0 %v2814_v47  ;;  %1388 = vmatprep.subr.mxu1 %v1387_v9  ;;  %v3673_v9 = vld [vmem:[#allocation13_spill] sm:$0xff] }
  0xb1   : > { %1461 = vmatprep.subr.mxu0 %v2843_v38  ;;  %1394 = vmatpush1.msra.mxu1 %v1393_v56  ;;  %v3674_v56 = vld [vmem:[#allocation12_spill] sm:$0xff] }
  0xb2   : > { %1464 = vmatpush1.msra.mxu0 %v2849_v41  ;;  %1400 = vmatprep.subr.mxu1 %v1399_v33  ;;  %v3675_v33 = vld [vmem:[#allocation14_spill] sm:$0xff] }
  0xb3   : > { %1467 = vmatprep.subr.mxu0 %v2889_v17  ;;  %1406 = vmatpush1.msra.mxu1 %v1405_v26  ;;  %v3676_v26 = vld [vmem:[#allocation19_spill] sm:$0xff] }
  0xb4   : > { %1439 = vmatprep.mubr.f32.mxu1 %v3564_v34  ;;  %1470 = vmatpush1.msra.mxu0 %v2857_v46 }
  0xb5   : > { %1441 = vmatmul.mubr.f32.vlgmr.msra.gmra.mxu1 %v3627_v61  ;;  %1473 = vmatprep.subr.mxu0 %v2909_v52  ;;  %v3680_v61 = vld [vmem:[#allocation21_spill] sm:$0xff] }
  0xb6   : > { %1585 = vmatprep.subr.mxu1 %v2784_v43  ;;  %1476 = vmatpush1.msra.mxu0 %v2895_v49 }
  0xb7   : > { %1587 = vmatpush1.msra.mxu1 %v2786_v16  ;;  %1479 = vmatprep.subr.mxu0 %v2921_v40 }
  0xb8   : > { %1589 = vmatprep.subr.mxu1 %v2805_v50  ;;  %1482 = vmatpush1.msra.mxu0 %v2903_v27 }
  0xb9   : > { %1591 = vmatpush1.msra.mxu1 %v2791_v58  ;;  %1485 = vmatprep.subr.mxu0 %v2958_v53 }
  0xba   : > { %1593 = vmatprep.subr.mxu1 %v2816_v7  ;;  %1488 = vmatpush1.msra.mxu0 %v2937_v37 }
  0xbb   : > { %1595 = vmatpush1.msra.mxu1 %v3664_v13  ;;  %1491 = vmatprep.subr.mxu0 %v3665_v18 }
  0xbc   : > { %1597 = vmatprep.subr.mxu1 %v3666_v20  ;;  %1494 = vmatpush1.msra.mxu0 %v3667_v55 }
  0xbd   : > { %1599 = vmatpush1.msra.mxu1 %v3668_v12  ;;  %1497 = vmatprep.subr.mxu0 %v3027_v11 }
  0xbe   : > { %1601 = vmatprep.subr.mxu1 %v3669_v28  ;;  %1500 = vmatpush1.msra.mxu0 %v3002_v57 }
  0xbf   : > { %1603 = vmatpush1.msra.mxu1 %v3670_v59  ;;  %1503 = vmatprep.subr.mxu0 %v3048_v63 }
  0xc0   : > { %1605 = vmatprep.subr.mxu1 %v3671_v54  ;;  %1506 = vmatpush1.msra.mxu0 %v3013_v30 }
  0xc1   : > { %1607 = vmatpush1.msra.mxu1 %v3672_v19  ;;  %1509 = vmatprep.subr.mxu0 %v3072_v2 }
  0xc2   : > { %1609 = vmatprep.subr.mxu1 %v3673_v9  ;;  %1512 = vmatpush1.msra.mxu0 %v3076_v35 }
  0xc3   : > { %1611 = vmatpush1.msra.mxu1 %v3674_v56  ;;  %1515 = vmatprep.subr.mxu0 %v3091_v23 }
  0xc4   : > { %1613 = vmatprep.subr.mxu1 %v3675_v33  ;;  %1518 = vmatpush1.msra.mxu0 %v3079_v39  ;;  %v3681_v39 = vld [vmem:[#allocation27_spill] sm:$0xff] }
  0xc5   : > { %1615 = vmatpush1.msra.mxu1 %v3676_v26  ;;  %1521 = vmatprep.subr.mxu0 %v3108_v0 }
  0xc6   : > { %1617 = vmatprep.subr.mxu1 %v3677_v31  ;;  %1524 = vmatpush1.msra.mxu0 %v3096_v29 }
  0xc7   : > { %1619 = vmatpush1.msra.mxu1 %v3678_v4  ;;  %1527 = vmatprep.subr.mxu0 %v3135_v22 }
  0xc8   : > { %1621 = vmatprep.subr.mxu1 %v3679_v6  ;;  %1530 = vmatpush1.msra.mxu0 %v3122_v48  ;;  %v3682_v48 = vld [vmem:[#allocation24_spill] sm:$0xff] }
  0xc9   : > { %1623 = vmatpush1.msra.mxu1 %v3680_v61  ;;  %1533 = vmatprep.subr.mxu0 %v3149_v14 }
  0xca   : > { %1625 = vmatprep.subr.mxu1 %v3681_v39  ;;  %1536 = vmatpush1.msra.mxu0 %v3153_v15  ;;  %v3683_v39 = vand.u32 4294901760, %v2808_v1  ;;  %v3687_v1 = vand.u32 4294901760, %v2843_v38  ;;  %v3692_v38 = vand.u32 4294901760, %v2909_v52  ;;  %v3696_v52 = vand.u32 4294901760, %v2958_v53 }
  0xcb   : > { %1627 = vmatpush1.msra.mxu1 %v3033_v45  ;;  %1539 = vmatprep.subr.mxu0 %v3165_v60  ;;  %v3684_v45 = vand.u32 4294901760, %v2803_v25  ;;  %v3688_v25 = vand.u32 4294901760, %v2849_v41  ;;  %v3693_v41 = vand.u32 4294901760, %v2895_v49  ;;  %v3702_v53 = vand.u32 4294901760, %v3048_v63 }
  0xcc   : > { %1629 = vmatprep.subr.mxu1 %v3045_v42  ;;  %1542 = vmatpush1.msra.mxu0 %v3169_v21  ;;  %v3685_v21 = vand.u32 4294901760, %v2834_v24  ;;  %v3689_v24 = vand.u32 4294901760, %v2889_v17  ;;  %v3694_v17 = vand.u32 4294901760, %v2921_v40  ;;  %v3703_v49 = vand.u32 4294901760, %v3013_v30 }
  0xcd   : > { %1575 = vmatprep.mubr.f32.mxu0 %v3564_v34  ;;  %1631 = vmatpush1.msra.mxu1 %v3035_v36  ;;  %v3686_v36 = vand.u32 4294901760, %v2814_v47  ;;  %v3690_v47 = vand.u32 4294901760, %v2857_v46  ;;  %v3695_v46 = vand.u32 4294901760, %v2903_v27  ;;  %v3704_v27 = vand.u32 4294901760, %v3072_v2 }
  0xce   : > { %1578 = vmatmul.mubr.f32.vlgmr.msra.gmra.mxu0 %v3682_v48  ;;  %1633 = vmatprep.subr.mxu1 %v3068_v5  ;;  %v3705_v40 = vand.u32 4294901760, %v3076_v35  ;;  %v3709_v2 = vand.u32 4294901760, %v3108_v0  ;;  %v3714_v35 = vand.u32 4294901760, %v3149_v14  ;;  %v3717_v48 = vld [vmem:[#allocation17_spill] sm:$0xff]  ;;  %v3718_v0 = vand.u32 4294901760, %v3165_v60  ;;  %v3722_v14 = vld [vmem:[#allocation23_spill] sm:$0xff] }
  0xcf   : > { %1693 = vmatprep.subr.mxu0 %v3683_v39  ;;  %1635 = vmatpush1.msra.mxu1 %v3060_v32  ;;  %v3715_v39 = vld [vmem:[#allocation27_spill] sm:$0xff] }
  0xd0   : > { %1697 = vmatpush1.msra.mxu0 %v3684_v45  ;;  %1637 = vmatprep.subr.mxu1 %v3098_v62  ;;  %v3691_v45 = vld [vmem:[#allocation25_spill] sm:$0xff] }
  0xd1   : > { %1701 = vmatprep.subr.mxu0 %v3685_v21  ;;  %1639 = vmatpush1.msra.mxu1 %v3088_v51 }
  0xd2   : > { %1705 = vmatpush1.msra.mxu0 %v3686_v36  ;;  %1641 = vmatprep.subr.mxu1 %v3114_v44  ;;  %v3712_v36 = vld [vmem:[#allocation30_spill] sm:$0xff] }
  0xd3   : > { %1709 = vmatprep.subr.mxu0 %v3687_v1  ;;  %1643 = vmatpush1.msra.mxu1 %v3124_v3  ;;  %v3713_v63 = vand.u32 4294901760, %v3712_v36 }
  0xd4   : > { %1713 = vmatpush1.msra.mxu0 %v3688_v25  ;;  %1645 = vmatprep.subr.mxu1 %v3131_v10 }
  0xd5   : > { %1717 = vmatprep.subr.mxu0 %v3689_v24  ;;  %1647 = vmatpush1.msra.mxu1 %v3141_v8 }
  0xd6   : > { %1680 = vmatprep.mubr.f32.mxu1 %v3564_v34  ;;  %1721 = vmatpush1.msra.mxu0 %v3690_v47 }
  0xd7   : > { %1684 = vmatmul.mubr.f32.vlgmr.msra.gmra.mxu1 %v3691_v45  ;;  %1725 = vmatprep.subr.mxu0 %v3692_v38 }
  0xd8   : > { %1859 = vmatprep.subr.mxu1 %v2784_v43  ;;  %1729 = vmatpush1.msra.mxu0 %v3693_v41  ;;  %v3697_v43 = vand.u32 4294901760, %v2937_v37  ;;  %v3706_v37 = vand.u32 4294901760, %v3091_v23  ;;  %v3711_v23 = vand.u32 4294901760, %v3135_v22  ;;  %v3719_v22 = vld [vmem:[#allocation31_spill] sm:$0xff] }
  0xd9   : > { %1861 = vmatpush1.msra.mxu1 %v2786_v16  ;;  %1733 = vmatprep.subr.mxu0 %v3694_v17  ;;  %v3698_v16 = vand.u32 4294901760, %v3665_v18 }
  0xda   : > { %1863 = vmatprep.subr.mxu1 %v2805_v50  ;;  %1737 = vmatpush1.msra.mxu0 %v3695_v46  ;;  %v3699_v50 = vand.u32 4294901760, %v3667_v55 }
  0xdb   : > { %1865 = vmatpush1.msra.mxu1 %v2791_v58  ;;  %1741 = vmatprep.subr.mxu0 %v3696_v52  ;;  %v3700_v58 = vand.u32 4294901760, %v3027_v11  ;;  %v3710_v11 = vand.u32 4294901760, %v3096_v29  ;;  %v3716_v29 = vand.u32 4294901760, %v3153_v15 }
  0xdc   : > { %1867 = vmatprep.subr.mxu1 %v2816_v7  ;;  %1745 = vmatpush1.msra.mxu0 %v3697_v43  ;;  %v3701_v7 = vand.u32 4294901760, %v3002_v57  ;;  %v3707_v57 = vld [vmem:[#allocation29_spill] sm:$0xff] }
  0xdd   : > { %1869 = vmatpush1.msra.mxu1 %v3664_v13  ;;  %1749 = vmatprep.subr.mxu0 %v3698_v16  ;;  %v3708_v30 = vand.u32 4294901760, %v3707_v57 }
  0xde   : > { %1871 = vmatprep.subr.mxu1 %v3666_v20  ;;  %1753 = vmatpush1.msra.mxu0 %v3699_v50 }
  0xdf   : > { %1873 = vmatpush1.msra.mxu1 %v3668_v12  ;;  %1757 = vmatprep.subr.mxu0 %v3700_v58 }
  0xe0   : > { %1875 = vmatprep.subr.mxu1 %v3669_v28  ;;  %1761 = vmatpush1.msra.mxu0 %v3701_v7 }
  0xe1   : > { %1877 = vmatpush1.msra.mxu1 %v3670_v59  ;;  %1765 = vmatprep.subr.mxu0 %v3702_v53 }
  0xe2   : > { %1879 = vmatprep.subr.mxu1 %v3671_v54  ;;  %1769 = vmatpush1.msra.mxu0 %v3703_v49 }
  0xe3   : > { %1881 = vmatpush1.msra.mxu1 %v3672_v19  ;;  %1773 = vmatprep.subr.mxu0 %v3704_v27 }
  0xe4   : > { %1883 = vmatprep.subr.mxu1 %v3673_v9  ;;  %1777 = vmatpush1.msra.mxu0 %v3705_v40 }
  0xe5   : > { %1885 = vmatpush1.msra.mxu1 %v3674_v56  ;;  %1781 = vmatprep.subr.mxu0 %v3706_v37 }
  0xe6   : > { %1887 = vmatprep.subr.mxu1 %v3675_v33  ;;  %1785 = vmatpush1.msra.mxu0 %v3708_v30 }
  0xe7   : > { %1889 = vmatpush1.msra.mxu1 %v3676_v26  ;;  %1789 = vmatprep.subr.mxu0 %v3709_v2 }
  0xe8   : > { %1891 = vmatprep.subr.mxu1 %v3677_v31  ;;  %1793 = vmatpush1.msra.mxu0 %v3710_v11  ;;  %v3720_v31 = vand.u32 4294901760, %v3719_v22 }
  0xe9   : > { %1893 = vmatpush1.msra.mxu1 %v3678_v4  ;;  %1797 = vmatprep.subr.mxu0 %v3711_v23 }
  0xea   : > { %1895 = vmatprep.subr.mxu1 %v3679_v6  ;;  %1801 = vmatpush1.msra.mxu0 %v3713_v63 }
  0xeb   : > { %1897 = vmatpush1.msra.mxu1 %v3680_v61  ;;  %1805 = vmatprep.subr.mxu0 %v3714_v35  ;;  %v3721_v61 = vld [vmem:[#allocation18_spill] sm:$0xff] }
  0xec   : > { %1899 = vmatprep.subr.mxu1 %v3715_v39  ;;  %1809 = vmatpush1.msra.mxu0 %v3716_v29 }
  0xed   : > { %1901 = vmatpush1.msra.mxu1 %v3717_v48  ;;  %1813 = vmatprep.subr.mxu0 %v3718_v0 }
  0xee   : > { %1903 = vmatprep.subr.mxu1 %v3045_v42  ;;  %1817 = vmatpush1.msra.mxu0 %v3720_v31 }
  0xef   : > { %1850 = vmatprep.mubr.f32.mxu0 %v3564_v34  ;;  %1905 = vmatpush1.msra.mxu1 %v3721_v61 }
  0xf0   : > { %1852 = vmatmul.mubr.f32.vlgmr.msra.gmra.mxu0 %v3722_v14  ;;  %1907 = vmatprep.subr.mxu1 %v3068_v5 }
  0xf1   : > { %1954 = vmatprep.mubr.f32.mxu1 %v3564_v34  ;;  %1909 = vmatpush1.msra.mxu1 %v3060_v32 }
  0xf2   : > { %1911 = vmatprep.subr.mxu1 %v3098_v62 }
  0xf3   : > { %1913 = vmatpush1.msra.mxu1 %v3088_v51 }
  0xf4   : > { %1915 = vmatprep.subr.mxu1 %v3114_v44 }
  0xf5   : > { %1917 = vmatpush1.msra.mxu1 %v3124_v3 }
  0xf6   : > { %1919 = vmatprep.subr.mxu1 %v3131_v10 }
  0xf7   : > { %1921 = vmatpush1.msra.mxu1 %v3141_v8 }
  0xf8   : > { %1956 = vmatmul.mubr.f32.vlgmr.msra.gmra.mxu1 %v3722_v14 }
 0x108   : > { %v355_v42 = vpop.f32.mrf.mxu0 }
 0x10a   : > { %v357_v5 = vpop.f32.mrf.mxu0 }
 0x10f   : > { %v587_v34 = vpop.f32.mrf.mxu1 }
 0x110   : > { %v588_v21 = vadd.f32 %v587_v34, %v355_v42 }
 0x111   : > { %v589_v32 = vpop.f32.mrf.mxu1 }
 0x112   : > { %v590_v6 = vadd.f32 %v589_v32, %v357_v5 }
 0x128   : > { %v724_v15 = vpop.f32.mrf.mxu0 }
 0x129   : > { %v725_v44 = vadd.f32 %v724_v15, %v588_v21 }
 0x12a   : > { %v726_v60 = vpop.f32.mrf.mxu0 }
 0x12b   : > { %v727_v3 = vadd.f32 %v726_v60, %v590_v6 }
 0x131   : > { %v830_v62 = vpop.f32.mrf.mxu1 }
 0x132   : > { %v831_v13 = vadd.f32 %v830_v62, %v725_v44 }
 0x133   : > { %v832_v4 = vpop.f32.mrf.mxu1 }
 0x134   : > { %v833_v8 = vadd.f32 %v832_v4, %v727_v3 }
 0x14a   : > { %v998_v51 = vpop.f32.mrf.mxu0 }
 0x14b   : > { %v999_v18 = vadd.f32 %v998_v51, %v831_v13 }
 0x14c   : > { %v1000_v10 = vpop.f32.mrf.mxu0 }
 0x14d   : > { %v1001_v55 = vadd.f32 %v1000_v10, %v833_v8 }
 0x153   : > { %v1102_v20 = vpop.f32.mrf.mxu1 }
 0x154   : > { %v1103_v12 = vadd.f32 %v1102_v20, %v999_v18 }
 0x155   : > { %v1104_v28 = vpop.f32.mrf.mxu1 }
 0x156   : > { %1963 = vst.msk [vmem:[%s3383_s30] sm:$0xff] %vm1962_vm0, %v1103_v12  ;;  %v1105_v59 = vadd.f32 %v1104_v28, %v1001_v55 }
 0x158   : > { %2073 = vst.msk [vmem:[%s3383_s30 + $0x8] sm:$0xff] %vm1962_vm0, %v1105_v59 }
 0x16d   : > { %v1210_v54 = vpop.f32.mrf.mxu0 }
 0x16f   : > { %v1212_v19 = vpop.f32.mrf.mxu0 }
 0x175   : > { %v1442_v9 = vpop.f32.mrf.mxu1 }
 0x176   : > { %v1443_v25 = vadd.f32 %v1442_v9, %v1210_v54 }
 0x177   : > { %v1444_v33 = vpop.f32.mrf.mxu1 }
 0x178   : > { %v1445_v47 = vadd.f32 %v1444_v33, %v1212_v19 }
 0x18e   : > { %v1579_v56 = vpop.f32.mrf.mxu0 }
 0x18f   : > { %v1580_v45 = vadd.f32 %v1579_v56, %v1443_v25 }
 0x190   : > { %v1581_v26 = vpop.f32.mrf.mxu0 }
 0x191   : > { %v1582_v41 = vadd.f32 %v1581_v26, %v1445_v47 }
 0x197   : > { %v1685_v1 = vpop.f32.mrf.mxu1 }
 0x198   : > { %v1686_v17 = vadd.f32 %v1685_v1, %v1580_v45 }
 0x199   : > { %v1687_v38 = vpop.f32.mrf.mxu1 }
 0x19a   : > { %v1688_v52 = vadd.f32 %v1687_v38, %v1582_v41 }
 0x1b0   : > { %v1853_v24 = vpop.f32.mrf.mxu0 }
 0x1b1   : > { %v1854_v43 = vadd.f32 %v1853_v24, %v1686_v17 }
 0x1b2   : > { %v1855_v46 = vpop.f32.mrf.mxu0 }
 0x1b3   : > { %v1856_v50 = vadd.f32 %v1855_v46, %v1688_v52 }
 0x1b8   : > { %v1957_v16 = vpop.f32.mrf.mxu1 }
 0x1b9   : > { %v1958_v58 = vadd.f32 %v1957_v16, %v1854_v43 }
 0x1ba   : > { %v1959_v7 = vpop.f32.mrf.mxu1 }
 0x1bb   : > { %2074 = vst.msk [vmem:[%s3383_s30 + $0x10] sm:$0xff] %vm1962_vm0, %v1958_v58  ;;  %v1960_v53 = vadd.f32 %v1959_v7, %v1856_v50 }
 0x1bd   : > { %2075 = vst.msk [vmem:[%s3383_s30 + $0x18] sm:$0xff] %vm1962_vm0, %v1960_v53 }
 0x1be PF: > { %s13_s11 = sadd.s32 1, %s2169_s11   ;;  %s3723_s9 = smov %s2165_s10 }
 0x1bf   : > { %p10_p2 = scmp.ge.s32.totalorder %s13_s11, 4   ;;  %s3724_s10 = smov %s3726_s13 }
 0x1c1   :  { %12 = sbr.rel (!%p10_p2) target bundleno = 2 (0x2), region = 66 }
 0x1c6   :  { %1997 = vsyncpa [#allocation3], 1 }
 0x1c7   :  { %1999 = vsyncpa [#allocation3 + $0x1], 1 }

</bundles_post_ra>
